<compile_context>
chip_gen: v7x
topology: tpu7x:2x2x1
jax: 0.10.0
libtpu: 0.0.40
codegen_flags: <defaults>
</compile_context>

<pallas_src>
import functools

import jax
import jax.numpy as jnp
from jax import lax
from jax.experimental import pallas as pl
from jax.experimental.pallas import tpu as pltpu

K1P = 32    # conv1 contraction 1*5*5 = 25, padded to 32
K2P = 256   # conv2 contraction 6*5*5 = 150, padded to 256


# ----------------------------------------------------------------------------
# Pallas kernels
# ----------------------------------------------------------------------------
def _conv1_pool_kernel(p_ref, w_ref, b_ref, o_ref):
    """conv1 (transposed matmul) + bias + ReLU + 2x2 max-pool.

    p_ref: (K1P, 4*N*144) bf16 patches^T, columns ordered (ph, pw, n, hp, wp)
    w_ref: (6, K1P) bf16;  b_ref: (6, 1) f32;  o_ref: (6, N*144) bf16
    """
    y = jnp.dot(w_ref[...], p_ref[...], preferred_element_type=jnp.float32)
    y = jnp.maximum(y + b_ref[...], 0.0)                      # (6, 4*N*144)
    q = o_ref.shape[1]                                        # N*144
    pooled = jnp.maximum(jnp.maximum(y[:, 0:q], y[:, q:2 * q]),
                         jnp.maximum(y[:, 2 * q:3 * q], y[:, 3 * q:4 * q]))
    o_ref[...] = pooled.astype(o_ref.dtype)


def _conv2_pool_fc_kernel(p_ref, w2_ref, b2_ref, fw1_ref, fb1_ref,
                          fw2_ref, fb2_ref, fw3_ref, fb3_ref, o_ref, *,
                          n_batch):
    """conv2 + ReLU + 2x2 pool + fc1 + fc2 + fc3, fully VMEM-resident.

    p_ref : (K2P, 4*16*N) bf16 patches^T, column = ((ph*2+pw)*16 + hp*4+wp)*N + n
    w2_ref: (16, K2P) bf16;  b2_ref: (16, 1) f32
    fw1_ref: (16, 120, 16) bf16 with fw1_ref[p][j, c] = fc1_weight[c*16+p, j]
    fw2_ref: (84, 120) bf16;  fw3_ref: (10, 84) bf16;  fb*: (out, 1) f32
    o_ref : (10, N) f32
    """
    y = jnp.dot(w2_ref[...], p_ref[...], preferred_element_type=jnp.float32)
    y = jnp.maximum(y + b2_ref[...], 0.0)                     # (16, 4*16*N)
    q = y.shape[1] // 4                                       # 16*N
    pooled = jnp.maximum(jnp.maximum(y[:, 0:q], y[:, q:2 * q]),
                         jnp.maximum(y[:, 2 * q:3 * q], y[:, 3 * q:4 * q]))
    pooled = pooled.astype(jnp.bfloat16)                      # (16, 16*N), col = p*N + n

    # fc1: contract over (channel, pooled position) as 16 small MXU matmuls.
    acc = jnp.zeros((120, n_batch), jnp.float32)
    for p in range(16):                                       # unrolled at trace time
        xp = pooled[:, p * n_batch:(p + 1) * n_batch]         # (16, N) bf16
        acc = acc + jnp.dot(fw1_ref[p], xp,
                            preferred_element_type=jnp.float32)
    h1 = jnp.maximum(acc + fb1_ref[...], 0.0).astype(jnp.bfloat16)   # (120, N)

    h2 = jnp.dot(fw2_ref[...], h1, preferred_element_type=jnp.float32) + fb2_ref[...]
    h2 = jnp.maximum(h2, 0.0).astype(jnp.bfloat16)                   # (84, N)

    out = jnp.dot(fw3_ref[...], h2, preferred_element_type=jnp.float32) + fb3_ref[...]
    o_ref[...] = out.astype(o_ref.dtype)                             # (10, N)


# ----------------------------------------------------------------------------
# Wrapper glue (one fused XLA patch-extraction per conv, no Python-loop im2col)
# ----------------------------------------------------------------------------
def _pool_ordered_patches(x_nchw, ksize, n_fast):
    """im2col producing a transposed, pool-friendly patch slab.

    Returns P^T of shape (C*K*K, 4*N*Hp*Wp). Row k = (c, kh, kw). Columns are
    ordered (ph, pw, n, hp, wp) if not n_fast else (ph, pw, hp, wp, n), where
    the conv output position is (ho, wo) = (2*hp + ph, 2*wp + pw), so the 2x2
    max-pool becomes an elementwise max of 4 contiguous lane blocks in-kernel.
    """
    N, C, H, W = x_nchw.shape
    Ho, Wo = H - ksize + 1, W - ksize + 1
    Hp, Wp = Ho // 2, Wo // 2
    p = lax.conv_general_dilated_patches(
        x_nchw, (ksize, ksize), (1, 1), "VALID",
        dimension_numbers=("NCHW", "OIHW", "NCHW"))          # (N, C*K*K, Ho, Wo)
    p = p.reshape(N, C * ksize * ksize, Hp, 2, Wp, 2)         # (n, k, hp, ph, wp, pw)
    perm = (1, 3, 5, 2, 4, 0) if n_fast else (1, 3, 5, 0, 2, 4)
    p = p.transpose(perm)
    return p.reshape(C * ksize * ksize, 4 * N * Hp * Wp), (N, Hp, Wp)


def _full_spec(shape):
    ndim = len(shape)
    return pl.BlockSpec(shape, lambda i: (0,) * ndim)


def net_forward(x, prep):
    N = x.shape[0]
    xb = x.astype(jnp.bfloat16)

    # ---- stage 1: conv1 + ReLU + pool (one Pallas kernel) -------------------
    p1, (_, hp1, wp1) = _pool_ordered_patches(xb, 5, n_fast=False)   # (25, 4*N*144)
    p1 = jnp.pad(p1, ((0, K1P - p1.shape[0]), (0, 0)))               # (32, 4*N*144)
    r1 = N * hp1 * wp1                                               # N*144
    pooled1 = pl.pallas_call(
        _conv1_pool_kernel,
        out_shape=jax.ShapeDtypeStruct((6, r1), jnp.bfloat16),
        grid=(1,),
        in_specs=[_full_spec(p1.shape),
                  _full_spec(prep["w1"].shape),
                  _full_spec(prep["b1"].shape)],
        out_specs=_full_spec((6, r1)),
        compiler_params=pltpu.CompilerParams(
            dimension_semantics=("arbitrary",)),
    )(p1, prep["w1"], prep["b1"])

    # tiny (6, N, 12, 12) -> NCHW reshuffle, fused by XLA with the next im2col
    pooled1 = pooled1.reshape(6, N, hp1, wp1).transpose(1, 0, 2, 3)  # (N, 6, 12, 12)

    # ---- stage 2: conv2 + ReLU + pool + fc1 + fc2 + fc3 (one Pallas kernel) -
    p2, _ = _pool_ordered_patches(pooled1, 5, n_fast=True)           # (150, 4*16*N)
    p2 = jnp.pad(p2, ((0, K2P - p2.shape[0]), (0, 0)))               # (256, 64*N)
    out_t = pl.pallas_call(
        functools.partial(_conv2_pool_fc_kernel, n_batch=N),
        out_shape=jax.ShapeDtypeStruct((10, N), jnp.float32),
        grid=(1,),
        in_specs=[_full_spec(p2.shape),
                  _full_spec(prep["w2"].shape),
                  _full_spec(prep["b2"].shape),
                  _full_spec(prep["fw1g"].shape),
                  _full_spec(prep["fb1"].shape),
                  _full_spec(prep["fw2t"].shape),
                  _full_spec(prep["fb2"].shape),
                  _full_spec(prep["fw3t"].shape),
                  _full_spec(prep["fb3"].shape)],
        out_specs=_full_spec((10, N)),
        compiler_params=pltpu.CompilerParams(
            dimension_semantics=("arbitrary",)),
    )(p2, prep["w2"], prep["b2"], prep["fw1g"], prep["fb1"],
      prep["fw2t"], prep["fb2"], prep["fw3t"], prep["fb3"])
    return out_t.T                                                   # (N, 10)


# ----------------------------------------------------------------------------
# One-time weight preparation (pad / permute / bf16-cast at init, not per call)
# ----------------------------------------------------------------------------
def prepare_params(params):
    w1 = params["w1"].reshape(6, 25)
    w1 = jnp.pad(w1, ((0, 0), (0, K1P - 25))).astype(jnp.bfloat16)    # (6, 32)
    w2 = params["w2"].reshape(16, 150)
    w2 = jnp.pad(w2, ((0, 0), (0, K2P - 150))).astype(jnp.bfloat16)   # (16, 256)
    # fc1 weight rows are the PyTorch flatten order c*16 + (h*4 + w); regroup
    # to (pool position p, out j, channel c) for the in-kernel 16-matmul sum.
    fw1g = params["fw1"].reshape(16, 16, 120).transpose(1, 2, 0)      # (p, j, c)
    return {
        "w1": w1, "b1": params["b1"].reshape(6, 1).astype(jnp.float32),
        "w2": w2, "b2": params["b2"].reshape(16, 1).astype(jnp.float32),
        "fw1g": fw1g.astype(jnp.bfloat16),
        "fb1": params["fb1"].reshape(120, 1).astype(jnp.float32),
        "fw2t": params["fw2"].T.astype(jnp.bfloat16),                 # (84, 120)
        "fb2": params["fb2"].reshape(84, 1).astype(jnp.float32),
        "fw3t": params["fw3"].T.astype(jnp.bfloat16),                 # (10, 84)
        "fb3": params["fb3"].reshape(10, 1).astype(jnp.float32),
    }


# ----------------------------------------------------------------------------
# Pure-JAX f32 reference (sanity check)
# ----------------------------------------------------------------------------
def ref_forward(x, params):
    def conv(x, w, b):
        y = lax.conv_general_dilated(
            x, w, (1, 1), "VALID", dimension_numbers=("NCHW", "OIHW", "NCHW"))
        return y + b.reshape(1, -1, 1, 1)

    def pool(x):
        return lax.reduce_window(
            x, -jnp.inf, lax.max, (1, 1, 2, 2), (1, 1, 2, 2), "VALID")

    x = pool(jax.nn.relu(conv(x, params["w1"], params["b1"])))
    x = pool(jax.nn.relu(conv(x, params["w2"], params["b2"])))
    x = x.reshape(x.shape[0], -1)
    x = jax.nn.relu(x @ params["fw1"] + params["fb1"])
    x = jax.nn.relu(x @ params["fw2"] + params["fb2"])
    return x @ params["fw3"] + params["fb3"]


# ----------------------------------------------------------------------------
# Deterministic parameters / input
# ----------------------------------------------------------------------------
def make_params(key):
    ks = jax.random.split(key, 10)

    def rnd(k, shape, scale):
        return scale * jax.random.normal(k, shape, dtype=jnp.float32)

    return {
        "w1": rnd(ks[0], (6, 1, 5, 5), 0.2),        # conv1
        "b1": rnd(ks[1], (6,), 0.1),
        "w2": rnd(ks[2], (16, 6, 5, 5), 0.1),       # conv2
        "b2": rnd(ks[3], (16,), 0.1),
        "fw1": rnd(ks[4], (256, 120), 0.05),        # fc1 (in, out)
        "fb1": rnd(ks[5], (1, 120), 0.05),
        "fw2": rnd(ks[6], (120, 84), 0.05),         # fc2
        "fb2": rnd(ks[7], (1, 84), 0.05),
        "fw3": rnd(ks[8], (84, 10), 0.05),          # fc3
        "fb3": rnd(ks[9], (1, 10), 0.05),
    }


if __name__ == "__main__":
    key = jax.random.PRNGKey(0)
    pkey, xkey = jax.random.split(key)
    params = make_params(pkey)
    # Input must be 28x28 (MNIST-style) for the 16*4*4 flatten to hold.
    x = jax.random.normal(xkey, (2, 1, 28, 28), dtype=jnp.float32)

    prep = prepare_params(params)
    fwd = jax.jit(net_forward)
    out = jax.block_until_ready(fwd(x, prep))

    assert out.shape == (2, 10), out.shape
    assert bool(jnp.all(jnp.isfinite(out)))

    ref = jax.block_until_ready(ref_forward(x, params))
    assert jnp.allclose(out, ref, rtol=2e-2, atol=2e-2), (out, ref)

    print("KERNEL_OK")
</pallas_src>

<mosaic_0001>
module attributes {stable_mosaic.version = 11 : i64} {
  func.func @_conv1_pool_kernel(%arg0: i32, %arg1: memref<32x1152xbf16, #tpu.memory_space<vmem>>, %arg2: memref<6x32xbf16, #tpu.memory_space<vmem>>, %arg3: memref<6x1xf32, #tpu.memory_space<vmem>>, %arg4: memref<6x288xbf16, #tpu.memory_space<vmem>>) attributes {dimension_semantics = [#tpu.dimension_semantics<arbitrary>], iteration_bounds = array<i64: 1>, scalar_prefetch = 0 : i64, scratch_operands = 0 : i64, tpu.core_type = #tpu.core_type<tc>, window_params = [{pipeline_mode = #tpu.pipeline_mode<synchronous>, transform_indices = @transform_0, window_bounds = array<i64: 32, 1152>}, {pipeline_mode = #tpu.pipeline_mode<synchronous>, transform_indices = @transform_1, window_bounds = array<i64: 6, 32>}, {pipeline_mode = #tpu.pipeline_mode<synchronous>, transform_indices = @transform_2, window_bounds = array<i64: 6, 1>}, {pipeline_mode = #tpu.pipeline_mode<synchronous>, transform_indices = @transform_3, window_bounds = array<i64: 6, 288>}]} {
    %c0 = arith.constant 0 : index
    %c0_0 = arith.constant 0 : index
    %0 = vector.load %arg2[%c0, %c0_0] : memref<6x32xbf16, #tpu.memory_space<vmem>>, vector<6x32xbf16>
    %c0_1 = arith.constant 0 : index
    %c0_2 = arith.constant 0 : index
    %1 = vector.load %arg1[%c0_1, %c0_2] : memref<32x1152xbf16, #tpu.memory_space<vmem>>, vector<32x1152xbf16>
    %cst = arith.constant dense<0.000000e+00> : vector<6x1152xf32>
    %2 = tpu.matmul %0, %1, %cst {dimension_numbers = #tpu.dot_dimension_numbers<[1], [0], [0], [1], [0, 0, 1, 1], [], []>} : vector<6x32xbf16>, vector<32x1152xbf16>, vector<6x1152xf32> -> vector<6x1152xf32>
    %c0_3 = arith.constant 0 : index
    %c0_4 = arith.constant 0 : index
    %3 = vector.load %arg3[%c0_3, %c0_4] : memref<6x1xf32, #tpu.memory_space<vmem>>, vector<6x1xf32>
    %4 = vector.broadcast %3 : vector<6x1xf32> to vector<6x1152xf32>
    %5 = arith.addf %2, %4 : vector<6x1152xf32>
    %cst_5 = arith.constant 0.000000e+00 : f32
    %6 = vector.broadcast %cst_5 : f32 to vector<6x1152xf32>
    %7 = arith.maximumf %5, %6 : vector<6x1152xf32>
    %8 = vector.extract_strided_slice %7 {offsets = [0, 0], sizes = [6, 288], strides = [1, 1]} : vector<6x1152xf32> to vector<6x288xf32>
    %9 = vector.extract_strided_slice %7 {offsets = [0, 288], sizes = [6, 288], strides = [1, 1]} : vector<6x1152xf32> to vector<6x288xf32>
    %10 = arith.maximumf %8, %9 : vector<6x288xf32>
    %11 = vector.extract_strided_slice %7 {offsets = [0, 576], sizes = [6, 288], strides = [1, 1]} : vector<6x1152xf32> to vector<6x288xf32>
    %12 = vector.extract_strided_slice %7 {offsets = [0, 864], sizes = [6, 288], strides = [1, 1]} : vector<6x1152xf32> to vector<6x288xf32>
    %13 = arith.maximumf %11, %12 : vector<6x288xf32>
    %14 = arith.maximumf %10, %13 : vector<6x288xf32>
    %15 = arith.truncf %14 : vector<6x288xf32> to vector<6x288xbf16>
    %c0_6 = arith.constant 0 : index
    %c0_7 = arith.constant 0 : index
    %16 = vector.load %arg4[%c0_6, %c0_7] : memref<6x288xbf16, #tpu.memory_space<vmem>>, vector<6x288xbf16>
    tpu.vector_store %arg4[%c0_6, %c0_7], %15 {strides = array<i32>} : memref<6x288xbf16, #tpu.memory_space<vmem>>, vector<6x288xbf16>,
    return
  }
  func.func @transform_0(%arg0: i32) -> (i32, i32) {
    %c0_i32 = arith.constant 0 : i32
    %c0_i32_0 = arith.constant 0 : i32
    %c0_i32_1 = arith.constant 0 : i32
    return %c0_i32, %c0_i32_0 : i32, i32
  }
  func.func @transform_1(%arg0: i32) -> (i32, i32) {
    %c0_i32 = arith.constant 0 : i32
    %c0_i32_0 = arith.constant 0 : i32
    %c0_i32_1 = arith.constant 0 : i32
    return %c0_i32, %c0_i32_0 : i32, i32
  }
  func.func @transform_2(%arg0: i32) -> (i32, i32) {
    %c0_i32 = arith.constant 0 : i32
    %c0_i32_0 = arith.constant 0 : i32
    %c0_i32_1 = arith.constant 0 : i32
    return %c0_i32, %c0_i32_0 : i32, i32
  }
  func.func @transform_3(%arg0: i32) -> (i32, i32) {
    %c0_i32 = arith.constant 0 : i32
    %c0_i32_0 = arith.constant 0 : i32
    %c0_i32_1 = arith.constant 0 : i32
    return %c0_i32, %c0_i32_0 : i32, i32
  }
}

module attributes {stable_mosaic.version = 11 : i64} {
  func.func @_conv2_pool_fc_kernel(%arg0: i32, %arg1: memref<256x128xbf16, #tpu.memory_space<vmem>>, %arg2: memref<16x256xbf16, #tpu.memory_space<vmem>>, %arg3: memref<16x1xf32, #tpu.memory_space<vmem>>, %arg4: memref<16x120x16xbf16, #tpu.memory_space<vmem>>, %arg5: memref<120x1xf32, #tpu.memory_space<vmem>>, %arg6: memref<84x120xbf16, #tpu.memory_space<vmem>>, %arg7: memref<84x1xf32, #tpu.memory_space<vmem>>, %arg8: memref<10x84xbf16, #tpu.memory_space<vmem>>, %arg9: memref<10x1xf32, #tpu.memory_space<vmem>>, %arg10: memref<10x2xf32, #tpu.memory_space<vmem>>) attributes {dimension_semantics = [#tpu.dimension_semantics<arbitrary>], iteration_bounds = array<i64: 1>, scalar_prefetch = 0 : i64, scratch_operands = 0 : i64, tpu.core_type = #tpu.core_type<tc>, window_params = [{pipeline_mode = #tpu.pipeline_mode<synchronous>, transform_indices = @transform_0, window_bounds = array<i64: 256, 128>}, {pipeline_mode = #tpu.pipeline_mode<synchronous>, transform_indices = @transform_1, window_bounds = array<i64: 16, 256>}, {pipeline_mode = #tpu.pipeline_mode<synchronous>, transform_indices = @transform_2, window_bounds = array<i64: 16, 1>}, {pipeline_mode = #tpu.pipeline_mode<synchronous>, transform_indices = @transform_3, window_bounds = array<i64: 16, 120, 16>}, {pipeline_mode = #tpu.pipeline_mode<synchronous>, transform_indices = @transform_4, window_bounds = array<i64: 120, 1>}, {pipeline_mode = #tpu.pipeline_mode<synchronous>, transform_indices = @transform_5, window_bounds = array<i64: 84, 120>}, {pipeline_mode = #tpu.pipeline_mode<synchronous>, transform_indices = @transform_6, window_bounds = array<i64: 84, 1>}, {pipeline_mode = #tpu.pipeline_mode<synchronous>, transform_indices = @transform_7, window_bounds = array<i64: 10, 84>}, {pipeline_mode = #tpu.pipeline_mode<synchronous>, transform_indices = @transform_8, window_bounds = array<i64: 10, 1>}, {pipeline_mode = #tpu.pipeline_mode<synchronous>, transform_indices = @transform_9, window_bounds = array<i64: 10, 2>}]} {
    %c0 = arith.constant 0 : index
    %c0_0 = arith.constant 0 : index
    %0 = vector.load %arg2[%c0, %c0_0] : memref<16x256xbf16, #tpu.memory_space<vmem>>, vector<16x256xbf16>
    %c0_1 = arith.constant 0 : index
    %c0_2 = arith.constant 0 : index
    %1 = vector.load %arg1[%c0_1, %c0_2] : memref<256x128xbf16, #tpu.memory_space<vmem>>, vector<256x128xbf16>
    %cst = arith.constant dense<0.000000e+00> : vector<16x128xf32>
    %2 = tpu.matmul %0, %1, %cst {dimension_numbers = #tpu.dot_dimension_numbers<[1], [0], [0], [1], [0, 0, 1, 1], [], []>} : vector<16x256xbf16>, vector<256x128xbf16>, vector<16x128xf32> -> vector<16x128xf32>
    %c0_3 = arith.constant 0 : index
    %c0_4 = arith.constant 0 : index
    %3 = vector.load %arg3[%c0_3, %c0_4] : memref<16x1xf32, #tpu.memory_space<vmem>>, vector<16x1xf32>
    %4 = vector.broadcast %3 : vector<16x1xf32> to vector<16x128xf32>
    %5 = arith.addf %2, %4 : vector<16x128xf32>
    %cst_5 = arith.constant 0.000000e+00 : f32
    %6 = vector.broadcast %cst_5 : f32 to vector<16x128xf32>
    %7 = arith.maximumf %5, %6 : vector<16x128xf32>
    %8 = vector.extract_strided_slice %7 {offsets = [0, 0], sizes = [16, 32], strides = [1, 1]} : vector<16x128xf32> to vector<16x32xf32>
    %9 = vector.extract_strided_slice %7 {offsets = [0, 32], sizes = [16, 32], strides = [1, 1]} : vector<16x128xf32> to vector<16x32xf32>
    %10 = arith.maximumf %8, %9 : vector<16x32xf32>
    %11 = vector.extract_strided_slice %7 {offsets = [0, 64], sizes = [16, 32], strides = [1, 1]} : vector<16x128xf32> to vector<16x32xf32>
    %12 = vector.extract_strided_slice %7 {offsets = [0, 96], sizes = [16, 32], strides = [1, 1]} : vector<16x128xf32> to vector<16x32xf32>
    %13 = arith.maximumf %11, %12 : vector<16x32xf32>
    %14 = arith.maximumf %10, %13 : vector<16x32xf32>
    %15 = arith.truncf %14 : vector<16x32xf32> to vector<16x32xbf16>
    %cst_6 = arith.constant 0.000000e+00 : f32
    %16 = vector.broadcast %cst_6 : f32 to vector<120x2xf32>
    %17 = vector.extract_strided_slice %15 {offsets = [0, 0], sizes = [16, 2], strides = [1, 1]} : vector<16x32xbf16> to vector<16x2xbf16>
    %c0_7 = arith.constant 0 : index
    %c0_8 = arith.constant 0 : index
    %c0_9 = arith.constant 0 : index
    %18 = vector.load %arg4[%c0_7, %c0_8, %c0_9] : memref<16x120x16xbf16, #tpu.memory_space<vmem>>, vector<1x120x16xbf16>
    %19 = vector.shape_cast %18 : vector<1x120x16xbf16> to vector<120x16xbf16>
    %cst_10 = arith.constant dense<0.000000e+00> : vector<120x2xf32>
    %20 = tpu.matmul %19, %17, %cst_10 {dimension_numbers = #tpu.dot_dimension_numbers<[1], [0], [0], [1], [0, 0, 1, 1], [], []>} : vector<120x16xbf16>, vector<16x2xbf16>, vector<120x2xf32> -> vector<120x2xf32>
    %21 = arith.addf %16, %20 : vector<120x2xf32>
    %22 = vector.extract_strided_slice %15 {offsets = [0, 2], sizes = [16, 2], strides = [1, 1]} : vector<16x32xbf16> to vector<16x2xbf16>
    %c1 = arith.constant 1 : index
    %c0_11 = arith.constant 0 : index
    %c0_12 = arith.constant 0 : index
    %23 = vector.load %arg4[%c1, %c0_11, %c0_12] : memref<16x120x16xbf16, #tpu.memory_space<vmem>>, vector<1x120x16xbf16>
    %24 = vector.shape_cast %23 : vector<1x120x16xbf16> to vector<120x16xbf16>
    %cst_13 = arith.constant dense<0.000000e+00> : vector<120x2xf32>
    %25 = tpu.matmul %24, %22, %cst_13 {dimension_numbers = #tpu.dot_dimension_numbers<[1], [0], [0], [1], [0, 0, 1, 1], [], []>} : vector<120x16xbf16>, vector<16x2xbf16>, vector<120x2xf32> -> vector<120x2xf32>
    %26 = arith.addf %21, %25 : vector<120x2xf32>
    %27 = vector.extract_strided_slice %15 {offsets = [0, 4], sizes = [16, 2], strides = [1, 1]} : vector<16x32xbf16> to vector<16x2xbf16>
    %c2 = arith.constant 2 : index
    %c0_14 = arith.constant 0 : index
    %c0_15 = arith.constant 0 : index
    %28 = vector.load %arg4[%c2, %c0_14, %c0_15] : memref<16x120x16xbf16, #tpu.memory_space<vmem>>, vector<1x120x16xbf16>
    %29 = vector.shape_cast %28 : vector<1x120x16xbf16> to vector<120x16xbf16>
    %cst_16 = arith.constant dense<0.000000e+00> : vector<120x2xf32>
    %30 = tpu.matmul %29, %27, %cst_16 {dimension_numbers = #tpu.dot_dimension_numbers<[1], [0], [0], [1], [0, 0, 1, 1], [], []>} : vector<120x16xbf16>, vector<16x2xbf16>, vector<120x2xf32> -> vector<120x2xf32>
    %31 = arith.addf %26, %30 : vector<120x2xf32>
    %32 = vector.extract_strided_slice %15 {offsets = [0, 6], sizes = [16, 2], strides = [1, 1]} : vector<16x32xbf16> to vector<16x2xbf16>
    %c3 = arith.constant 3 : index
    %c0_17 = arith.constant 0 : index
    %c0_18 = arith.constant 0 : index
    %33 = vector.load %arg4[%c3, %c0_17, %c0_18] : memref<16x120x16xbf16, #tpu.memory_space<vmem>>, vector<1x120x16xbf16>
    %34 = vector.shape_cast %33 : vector<1x120x16xbf16> to vector<120x16xbf16>
    %cst_19 = arith.constant dense<0.000000e+00> : vector<120x2xf32>
    %35 = tpu.matmul %34, %32, %cst_19 {dimension_numbers = #tpu.dot_dimension_numbers<[1], [0], [0], [1], [0, 0, 1, 1], [], []>} : vector<120x16xbf16>, vector<16x2xbf16>, vector<120x2xf32> -> vector<120x2xf32>
    %36 = arith.addf %31, %35 : vector<120x2xf32>
    %37 = vector.extract_strided_slice %15 {offsets = [0, 8], sizes = [16, 2], strides = [1, 1]} : vector<16x32xbf16> to vector<16x2xbf16>
    %c4 = arith.constant 4 : index
    %c0_20 = arith.constant 0 : index
    %c0_21 = arith.constant 0 : index
    %38 = vector.load %arg4[%c4, %c0_20, %c0_21] : memref<16x120x16xbf16, #tpu.memory_space<vmem>>, vector<1x120x16xbf16>
    %39 = vector.shape_cast %38 : vector<1x120x16xbf16> to vector<120x16xbf16>
    %cst_22 = arith.constant dense<0.000000e+00> : vector<120x2xf32>
    %40 = tpu.matmul %39, %37, %cst_22 {dimension_numbers = #tpu.dot_dimension_numbers<[1], [0], [0], [1], [0, 0, 1, 1], [], []>} : vector<120x16xbf16>, vector<16x2xbf16>, vector<120x2xf32> -> vector<120x2xf32>
    %41 = arith.addf %36, %40 : vector<120x2xf32>
    %42 = vector.extract_strided_slice %15 {offsets = [0, 10], sizes = [16, 2], strides = [1, 1]} : vector<16x32xbf16> to vector<16x2xbf16>
    %c5 = arith.constant 5 : index
    %c0_23 = arith.constant 0 : index
    %c0_24 = arith.constant 0 : index
    %43 = vector.load %arg4[%c5, %c0_23, %c0_24] : memref<16x120x16xbf16, #tpu.memory_space<vmem>>, vector<1x120x16xbf16>
    %44 = vector.shape_cast %43 : vector<1x120x16xbf16> to vector<120x16xbf16>
    %cst_25 = arith.constant dense<0.000000e+00> : vector<120x2xf32>
    %45 = tpu.matmul %44, %42, %cst_25 {dimension_numbers = #tpu.dot_dimension_numbers<[1], [0], [0], [1], [0, 0, 1, 1], [], []>} : vector<120x16xbf16>, vector<16x2xbf16>, vector<120x2xf32> -> vector<120x2xf32>
    %46 = arith.addf %41, %45 : vector<120x2xf32>
    %47 = vector.extract_strided_slice %15 {offsets = [0, 12], sizes = [16, 2], strides = [1, 1]} : vector<16x32xbf16> to vector<16x2xbf16>
    %c6 = arith.constant 6 : index
    %c0_26 = arith.constant 0 : index
    %c0_27 = arith.constant 0 : index
    %48 = vector.load %arg4[%c6, %c0_26, %c0_27] : memref<16x120x16xbf16, #tpu.memory_space<vmem>>, vector<1x120x16xbf16>
    %49 = vector.shape_cast %48 : vector<1x120x16xbf16> to vector<120x16xbf16>
    %cst_28 = arith.constant dense<0.000000e+00> : vector<120x2xf32>
    %50 = tpu.matmul %49, %47, %cst_28 {dimension_numbers = #tpu.dot_dimension_numbers<[1], [0], [0], [1], [0, 0, 1, 1], [], []>} : vector<120x16xbf16>, vector<16x2xbf16>, vector<120x2xf32> -> vector<120x2xf32>
    %51 = arith.addf %46, %50 : vector<120x2xf32>
    %52 = vector.extract_strided_slice %15 {offsets = [0, 14], sizes = [16, 2], strides = [1, 1]} : vector<16x32xbf16> to vector<16x2xbf16>
    %c7 = arith.constant 7 : index
    %c0_29 = arith.constant 0 : index
    %c0_30 = arith.constant 0 : index
    %53 = vector.load %arg4[%c7, %c0_29, %c0_30] : memref<16x120x16xbf16, #tpu.memory_space<vmem>>, vector<1x120x16xbf16>
    %54 = vector.shape_cast %53 : vector<1x120x16xbf16> to vector<120x16xbf16>
    %cst_31 = arith.constant dense<0.000000e+00> : vector<120x2xf32>
    %55 = tpu.matmul %54, %52, %cst_31 {dimension_numbers = #tpu.dot_dimension_numbers<[1], [0], [0], [1], [0, 0, 1, 1], [], []>} : vector<120x16xbf16>, vector<16x2xbf16>, vector<120x2xf32> -> vector<120x2xf32>
    %56 = arith.addf %51, %55 : vector<120x2xf32>
    %57 = vector.extract_strided_slice %15 {offsets = [0, 16], sizes = [16, 2], strides = [1, 1]} : vector<16x32xbf16> to vector<16x2xbf16>
    %c8 = arith.constant 8 : index
    %c0_32 = arith.constant 0 : index
    %c0_33 = arith.constant 0 : index
    %58 = vector.load %arg4[%c8, %c0_32, %c0_33] : memref<16x120x16xbf16, #tpu.memory_space<vmem>>, vector<1x120x16xbf16>
    %59 = vector.shape_cast %58 : vector<1x120x16xbf16> to vector<120x16xbf16>
    %cst_34 = arith.constant dense<0.000000e+00> : vector<120x2xf32>
    %60 = tpu.matmul %59, %57, %cst_34 {dimension_numbers = #tpu.dot_dimension_numbers<[1], [0], [0], [1], [0, 0, 1, 1], [], []>} : vector<120x16xbf16>, vector<16x2xbf16>, vector<120x2xf32> -> vector<120x2xf32>
    %61 = arith.addf %56, %60 : vector<120x2xf32>
    %62 = vector.extract_strided_slice %15 {offsets = [0, 18], sizes = [16, 2], strides = [1, 1]} : vector<16x32xbf16> to vector<16x2xbf16>
    %c9 = arith.constant 9 : index
    %c0_35 = arith.constant 0 : index
    %c0_36 = arith.constant 0 : index
    %63 = vector.load %arg4[%c9, %c0_35, %c0_36] : memref<16x120x16xbf16, #tpu.memory_space<vmem>>, vector<1x120x16xbf16>
    %64 = vector.shape_cast %63 : vector<1x120x16xbf16> to vector<120x16xbf16>
    %cst_37 = arith.constant dense<0.000000e+00> : vector<120x2xf32>
    %65 = tpu.matmul %64, %62, %cst_37 {dimension_numbers = #tpu.dot_dimension_numbers<[1], [0], [0], [1], [0, 0, 1, 1], [], []>} : vector<120x16xbf16>, vector<16x2xbf16>, vector<120x2xf32> -> vector<120x2xf32>
    %66 = arith.addf %61, %65 : vector<120x2xf32>
    %67 = vector.extract_strided_slice %15 {offsets = [0, 20], sizes = [16, 2], strides = [1, 1]} : vector<16x32xbf16> to vector<16x2xbf16>
    %c10 = arith.constant 10 : index
    %c0_38 = arith.constant 0 : index
    %c0_39 = arith.constant 0 : index
    %68 = vector.load %arg4[%c10, %c0_38, %c0_39] : memref<16x120x16xbf16, #tpu.memory_space<vmem>>, vector<1x120x16xbf16>
    %69 = vector.shape_cast %68 : vector<1x120x16xbf16> to vector<120x16xbf16>
    %cst_40 = arith.constant dense<0.000000e+00> : vector<120x2xf32>
    %70 = tpu.matmul %69, %67, %cst_40 {dimension_numbers = #tpu.dot_dimension_numbers<[1], [0], [0], [1], [0, 0, 1, 1], [], []>} : vector<120x16xbf16>, vector<16x2xbf16>, vector<120x2xf32> -> vector<120x2xf32>
    %71 = arith.addf %66, %70 : vector<120x2xf32>
    %72 = vector.extract_strided_slice %15 {offsets = [0, 22], sizes = [16, 2], strides = [1, 1]} : vector<16x32xbf16> to vector<16x2xbf16>
    %c11 = arith.constant 11 : index
    %c0_41 = arith.constant 0 : index
    %c0_42 = arith.constant 0 : index
    %73 = vector.load %arg4[%c11, %c0_41, %c0_42] : memref<16x120x16xbf16, #tpu.memory_space<vmem>>, vector<1x120x16xbf16>
    %74 = vector.shape_cast %73 : vector<1x120x16xbf16> to vector<120x16xbf16>
    %cst_43 = arith.constant dense<0.000000e+00> : vector<120x2xf32>
    %75 = tpu.matmul %74, %72, %cst_43 {dimension_numbers = #tpu.dot_dimension_numbers<[1], [0], [0], [1], [0, 0, 1, 1], [], []>} : vector<120x16xbf16>, vector<16x2xbf16>, vector<120x2xf32> -> vector<120x2xf32>
    %76 = arith.addf %71, %75 : vector<120x2xf32>
    %77 = vector.extract_strided_slice %15 {offsets = [0, 24], sizes = [16, 2], strides = [1, 1]} : vector<16x32xbf16> to vector<16x2xbf16>
    %c12 = arith.constant 12 : index
    %c0_44 = arith.constant 0 : index
    %c0_45 = arith.constant 0 : index
    %78 = vector.load %arg4[%c12, %c0_44, %c0_45] : memref<16x120x16xbf16, #tpu.memory_space<vmem>>, vector<1x120x16xbf16>
    %79 = vector.shape_cast %78 : vector<1x120x16xbf16> to vector<120x16xbf16>
    %cst_46 = arith.constant dense<0.000000e+00> : vector<120x2xf32>
    %80 = tpu.matmul %79, %77, %cst_46 {dimension_numbers = #tpu.dot_dimension_numbers<[1], [0], [0], [1], [0, 0, 1, 1], [], []>} : vector<120x16xbf16>, vector<16x2xbf16>, vector<120x2xf32> -> vector<120x2xf32>
    %81 = arith.addf %76, %80 : vector<120x2xf32>
    %82 = vector.extract_strided_slice %15 {offsets = [0, 26], sizes = [16, 2], strides = [1, 1]} : vector<16x32xbf16> to vector<16x2xbf16>
    %c13 = arith.constant 13 : index
    %c0_47 = arith.constant 0 : index
    %c0_48 = arith.constant 0 : index
    %83 = vector.load %arg4[%c13, %c0_47, %c0_48] : memref<16x120x16xbf16, #tpu.memory_space<vmem>>, vector<1x120x16xbf16>
    %84 = vector.shape_cast %83 : vector<1x120x16xbf16> to vector<120x16xbf16>
    %cst_49 = arith.constant dense<0.000000e+00> : vector<120x2xf32>
    %85 = tpu.matmul %84, %82, %cst_49 {dimension_numbers = #tpu.dot_dimension_numbers<[1], [0], [0], [1], [0, 0, 1, 1], [], []>} : vector<120x16xbf16>, vector<16x2xbf16>, vector<120x2xf32> -> vector<120x2xf32>
    %86 = arith.addf %81, %85 : vector<120x2xf32>
    %87 = vector.extract_strided_slice %15 {offsets = [0, 28], sizes = [16, 2], strides = [1, 1]} : vector<16x32xbf16> to vector<16x2xbf16>
    %c14 = arith.constant 14 : index
    %c0_50 = arith.constant 0 : index
    %c0_51 = arith.constant 0 : index
    %88 = vector.load %arg4[%c14, %c0_50, %c0_51] : memref<16x120x16xbf16, #tpu.memory_space<vmem>>, vector<1x120x16xbf16>
    %89 = vector.shape_cast %88 : vector<1x120x16xbf16> to vector<120x16xbf16>
    %cst_52 = arith.constant dense<0.000000e+00> : vector<120x2xf32>
    %90 = tpu.matmul %89, %87, %cst_52 {dimension_numbers = #tpu.dot_dimension_numbers<[1], [0], [0], [1], [0, 0, 1, 1], [], []>} : vector<120x16xbf16>, vector<16x2xbf16>, vector<120x2xf32> -> vector<120x2xf32>
    %91 = arith.addf %86, %90 : vector<120x2xf32>
    %92 = vector.extract_strided_slice %15 {offsets = [0, 30], sizes = [16, 2], strides = [1, 1]} : vector<16x32xbf16> to vector<16x2xbf16>
    %c15 = arith.constant 15 : index
    %c0_53 = arith.constant 0 : index
    %c0_54 = arith.constant 0 : index
    %93 = vector.load %arg4[%c15, %c0_53, %c0_54] : memref<16x120x16xbf16, #tpu.memory_space<vmem>>, vector<1x120x16xbf16>
    %94 = vector.shape_cast %93 : vector<1x120x16xbf16> to vector<120x16xbf16>
    %cst_55 = arith.constant dense<0.000000e+00> : vector<120x2xf32>
    %95 = tpu.matmul %94, %92, %cst_55 {dimension_numbers = #tpu.dot_dimension_numbers<[1], [0], [0], [1], [0, 0, 1, 1], [], []>} : vector<120x16xbf16>, vector<16x2xbf16>, vector<120x2xf32> -> vector<120x2xf32>
    %96 = arith.addf %91, %95 : vector<120x2xf32>
    %c0_56 = arith.constant 0 : index
    %c0_57 = arith.constant 0 : index
    %97 = vector.load %arg5[%c0_56, %c0_57] : memref<120x1xf32, #tpu.memory_space<vmem>>, vector<120x1xf32>
    %98 = vector.broadcast %97 : vector<120x1xf32> to vector<120x2xf32>
    %99 = arith.addf %96, %98 : vector<120x2xf32>
    %cst_58 = arith.constant 0.000000e+00 : f32
    %100 = vector.broadcast %cst_58 : f32 to vector<120x2xf32>
    %101 = arith.maximumf %99, %100 : vector<120x2xf32>
    %102 = arith.truncf %101 : vector<120x2xf32> to vector<120x2xbf16>
    %c0_59 = arith.constant 0 : index
    %c0_60 = arith.constant 0 : index
    %103 = vector.load %arg6[%c0_59, %c0_60] : memref<84x120xbf16, #tpu.memory_space<vmem>>, vector<84x120xbf16>
    %cst_61 = arith.constant dense<0.000000e+00> : vector<84x2xf32>
    %104 = tpu.matmul %103, %102, %cst_61 {dimension_numbers = #tpu.dot_dimension_numbers<[1], [0], [0], [1], [0, 0, 1, 1], [], []>} : vector<84x120xbf16>, vector<120x2xbf16>, vector<84x2xf32> -> vector<84x2xf32>
    %c0_62 = arith.constant 0 : index
    %c0_63 = arith.constant 0 : index
    %105 = vector.load %arg7[%c0_62, %c0_63] : memref<84x1xf32, #tpu.memory_space<vmem>>, vector<84x1xf32>
    %106 = vector.broadcast %105 : vector<84x1xf32> to vector<84x2xf32>
    %107 = arith.addf %104, %106 : vector<84x2xf32>
    %cst_64 = arith.constant 0.000000e+00 : f32
    %108 = vector.broadcast %cst_64 : f32 to vector<84x2xf32>
    %109 = arith.maximumf %107, %108 : vector<84x2xf32>
    %110 = arith.truncf %109 : vector<84x2xf32> to vector<84x2xbf16>
    %c0_65 = arith.constant 0 : index
    %c0_66 = arith.constant 0 : index
    %111 = vector.load %arg8[%c0_65, %c0_66] : memref<10x84xbf16, #tpu.memory_space<vmem>>, vector<10x84xbf16>
    %cst_67 = arith.constant dense<0.000000e+00> : vector<10x2xf32>
    %112 = tpu.matmul %111, %110, %cst_67 {dimension_numbers = #tpu.dot_dimension_numbers<[1], [0], [0], [1], [0, 0, 1, 1], [], []>} : vector<10x84xbf16>, vector<84x2xbf16>, vector<10x2xf32> -> vector<10x2xf32>
    %c0_68 = arith.constant 0 : index
    %c0_69 = arith.constant 0 : index
    %113 = vector.load %arg9[%c0_68, %c0_69] : memref<10x1xf32, #tpu.memory_space<vmem>>, vector<10x1xf32>
    %114 = vector.broadcast %113 : vector<10x1xf32> to vector<10x2xf32>
    %115 = arith.addf %112, %114 : vector<10x2xf32>
    %c0_70 = arith.constant 0 : index
    %c0_71 = arith.constant 0 : index
    %116 = vector.load %arg10[%c0_70, %c0_71] : memref<10x2xf32, #tpu.memory_space<vmem>>, vector<10x2xf32>
    tpu.vector_store %arg10[%c0_70, %c0_71], %115 {strides = array<i32>} : memref<10x2xf32, #tpu.memory_space<vmem>>, vector<10x2xf32>,
    return
  }
  func.func @transform_0(%arg0: i32) -> (i32, i32) {
    %c0_i32 = arith.constant 0 : i32
    %c0_i32_0 = arith.constant 0 : i32
    %c0_i32_1 = arith.constant 0 : i32
    return %c0_i32, %c0_i32_0 : i32, i32
  }
  func.func @transform_1(%arg0: i32) -> (i32, i32) {
    %c0_i32 = arith.constant 0 : i32
    %c0_i32_0 = arith.constant 0 : i32
    %c0_i32_1 = arith.constant 0 : i32
    return %c0_i32, %c0_i32_0 : i32, i32
  }
  func.func @transform_2(%arg0: i32) -> (i32, i32) {
    %c0_i32 = arith.constant 0 : i32
    %c0_i32_0 = arith.constant 0 : i32
    %c0_i32_1 = arith.constant 0 : i32
    return %c0_i32, %c0_i32_0 : i32, i32
  }
  func.func @transform_3(%arg0: i32) -> (i32, i32, i32) {
    %c0_i32 = arith.constant 0 : i32
    %c0_i32_0 = arith.constant 0 : i32
    %c0_i32_1 = arith.constant 0 : i32
    %c0_i32_2 = arith.constant 0 : i32
    return %c0_i32, %c0_i32_0, %c0_i32_1 : i32, i32, i32
  }
  func.func @transform_4(%arg0: i32) -> (i32, i32) {
    %c0_i32 = arith.constant 0 : i32
    %c0_i32_0 = arith.constant 0 : i32
    %c0_i32_1 = arith.constant 0 : i32
    return %c0_i32, %c0_i32_0 : i32, i32
  }
  func.func @transform_5(%arg0: i32) -> (i32, i32) {
    %c0_i32 = arith.constant 0 : i32
    %c0_i32_0 = arith.constant 0 : i32
    %c0_i32_1 = arith.constant 0 : i32
    return %c0_i32, %c0_i32_0 : i32, i32
  }
  func.func @transform_6(%arg0: i32) -> (i32, i32) {
    %c0_i32 = arith.constant 0 : i32
    %c0_i32_0 = arith.constant 0 : i32
    %c0_i32_1 = arith.constant 0 : i32
    return %c0_i32, %c0_i32_0 : i32, i32
  }
  func.func @transform_7(%arg0: i32) -> (i32, i32) {
    %c0_i32 = arith.constant 0 : i32
    %c0_i32_0 = arith.constant 0 : i32
    %c0_i32_1 = arith.constant 0 : i32
    return %c0_i32, %c0_i32_0 : i32, i32
  }
  func.func @transform_8(%arg0: i32) -> (i32, i32) {
    %c0_i32 = arith.constant 0 : i32
    %c0_i32_0 = arith.constant 0 : i32
    %c0_i32_1 = arith.constant 0 : i32
    return %c0_i32, %c0_i32_0 : i32, i32
  }
  func.func @transform_9(%arg0: i32) -> (i32, i32) {
    %c0_i32 = arith.constant 0 : i32
    %c0_i32_0 = arith.constant 0 : i32
    %c0_i32_1 = arith.constant 0 : i32
    return %c0_i32, %c0_i32_0 : i32, i32
  }
}

</mosaic_0001>

<bundles_post_ra>
// kernel: net_forward.2
= control target key start
LH: loop header
LB: loop body
LE: loop exit
PB: predicated region body
PF: predicated region fallthrough
CT: control target
= control target key end

     0   :  { %v509_v1 = vmov 0   ;;  %vm134_vm0 = vcmask 261120   ;;  %v510_v20 = vmov 0.0   ;;  %vm511_vm1 = vmmov 0   ;;  %s609_s0 = inlined_call_operand.vmem [shape: bf16[32,1152], index: 0, kind: input, shape index: {}]   ;;  %s610_s1 = inlined_call_operand.vmem [shape: bf16[6,32], index: 1, kind: input, shape index: {}]   ;;  %s611_s2 = inlined_call_operand.vmem [shape: f32[6,1], index: 2, kind: input, shape index: {}]   ;;  %s612_s3 = inlined_call_operand.vmem [shape: bf16[6,288], index: 3, kind: output, shape index: {}]  }
   0x1   :  { %v483_v0 = vld [vmem:[%s609_s0 + $0x4] ss:$36 sps:$4 sm:$0xff]   ;;  %170 = vmatprep.mubr.bf16.mxu0 %v509_v1  ;;  %211 = vmatprep.mubr.bf16.mxu1 %v509_v1  ;;  %v485_v2 = vld [vmem:[%s609_s0 + $0xc] ss:$36 sps:$4 sm:$0xff]   ;;  %v491_v6 = vld [vmem:[%s609_s0 + $0x54] ss:$36 sps:$4 sm:$0xff]  }
   0x2   :  { %467 = vset.pattern.permute.xlu0 %v509_v1  ;;  %138 = vmatprep.subr.bf16.mxu0 %v483_v0  ;;  %v487_v3 = vld [vmem:[%s609_s0] ss:$36 sps:$4 sm:$0xff]   ;;  %v488_v4 = vld [vmem:[%s609_s0 + $0x8] ss:$36 sps:$4 sm:$0xff]   ;;  %v494_v8 = vld [vmem:[%s609_s0 + $0x50] ss:$36 sps:$4 sm:$0xff]  }
   0x3   :  { %179 = vmatprep.subr.bf16.mxu1 %v485_v2  ;;  %v489_v5 = vld [vmem:[%s609_s0 + $0x4c] ss:$36 sps:$4 sm:$0xff]   ;;  %139 = vmatpush1.bf16.msra.mxu0 %v487_v3  ;;  %v15_v9 = vld [vmem:[%s610_s1] sm:$0x7]  ;;  %v497_v11 = vld [vmem:[%s609_s0 + $0x14] ss:$36 sps:$4 sm:$0xff]  }
   0x4   :  { %180 = vmatpush1.bf16.msra.mxu1 %v488_v4  ;;  %v493_v7 = vld [vmem:[%s609_s0 + $0x48] ss:$36 sps:$4 sm:$0xff]   ;;  %140 = vmatprep.subr.bf16.mxu0 %v489_v5  ;;  %v495_v10 = vld [vmem:[%s609_s0 + $0x10] ss:$36 sps:$4 sm:$0xff]   ;;  %v498_v12 = vld [vmem:[%s609_s0 + $0x18] ss:$36 sps:$4 sm:$0xff]  }
   0x5   :  { %181 = vmatprep.subr.bf16.mxu1 %v491_v6  ;;  %v500_v13 = vld [vmem:[%s609_s0 + $0x1c] ss:$36 sps:$4 sm:$0xff]   ;;  %v506_v15 = vld [vmem:[%s609_s0 + $0x64] ss:$36 sps:$4 sm:$0xff]   ;;  %vm360_vm2 = vcmask 785408   ;;  %vm418_vm3 = vcmask 256000  }
   0x6   :  { %v503_v14 = vld [vmem:[%s609_s0 + $0x5c] ss:$36 sps:$4 sm:$0xff]   ;;  %v508_v21 = vld [vmem:[%s609_s0 + $0x68] ss:$36 sps:$4 sm:$0xff]   ;;  %vm395_vm4 = vcmask 523264  }
   0x7   :  { %141 = vmatpush1.bf16.msra.mxu0 %v493_v7  ;;  %v501_v16 = vld [vmem:[%s609_s0 + $0x58] ss:$36 sps:$4 sm:$0xff]   ;;  %v504_v17 = vld [vmem:[%s609_s0 + $0x60] ss:$36 sps:$4 sm:$0xff]  }
   0x8   :  { %182 = vmatpush1.bf16.msra.mxu1 %v494_v8  ;;  %220 = vmatprep.subr.bf16.mxu0 %v497_v11  ;;  %v36_v18 = vld [vmem:[%s611_s2] sm:$0x3f]  ;;  %s513_s2 = smov 64  }
   0x9   :  { %261 = vmatprep.subr.bf16.mxu1 %v500_v13  ;;  %39 = vperm.xlu0 %467, %v36_v18   ;;  %v507_v19 = vld [vmem:[%s609_s0 + $0x20] ss:$36 sps:$4 sm:$0xff]   ;;  %s512_s0 = smov 96  }
   0xa   :  { %442 = vmatmul.mubr.msk.bf16.vlgmr.msra.gmra.mrb[0].mxu0 %vm134_vm0, %v15_v9 }
   0xb   :  { %443 = vmatmul.mubr.msk.bf16.vlgmr.msra.gmra.mrb[0].mxu1 %vm134_vm0, %v15_v9  ;;  %221 = vmatpush1.bf16.msra.mxu0 %v495_v10 }
   0xc   :  { %262 = vmatpush1.bf16.msra.mxu1 %v498_v12  ;;  %222 = vmatprep.subr.bf16.mxu0 %v503_v14 }
   0xd   :  { %263 = vmatprep.subr.bf16.mxu1 %v506_v15  ;;  %252 = vmatprep.mubr.bf16.mxu0 %v509_v1 }
   0xe   :  { %293 = vmatprep.mubr.bf16.mxu1 %v509_v1 }
   0xf   :  { %223 = vmatpush1.bf16.msra.mxu0 %v501_v16 }
  0x10   :  { %264 = vmatpush1.bf16.msra.mxu1 %v504_v17  ;;  %454 = vmatprep.subr.bf16.mxu0 %v510_v20 }
  0x12   :  { %444 = vmatmul.mubr.msk.bf16.vlgmr.msra.gmra.mrb[4].mxu0 %vm134_vm0, %v15_v9 }
  0x13   :  { %445 = vmatmul.mubr.msk.bf16.vlgmr.msra.gmra.mrb[4].mxu1 %vm134_vm0, %v15_v9  ;;  %455 = vmatpush3.bf16.msra.mxu0 %v507_v19 }
  0x14   :  { %458 = vmatprep.mubr.msk.bf16.mxu0 %vm511_vm1, %v510_v20  ;;  %456 = vmatprep.subr.bf16.mxu0 %v510_v20 }
  0x17   :  { %457 = vmatpush3.bf16.msra.mxu0 %v508_v21 }
  0x1a   :  { %459 = vmatmul.mubr.msk.bf16.vlgmr.msra.gmra.mrb[8].mxu0 %vm134_vm0, %v15_v9 }
  0x88   :  { %v40_v30 = vpop.permute.xlu0 %39 }
  0xdd   :  { %v172_v22 = vpop.f32.mrb[0].mxu0 }
  0xde   :  { %v213_v23 = vpop.f32.mrb[0].mxu1  ;;  %v174_v24 = vpop.f32.mrb[1].mxu0  ;;  %v173_v4 = vadd.f32 %v172_v22, %v40_v30 }
  0xdf   :  { %v215_v25 = vpop.f32.mrb[1].mxu1  ;;  %v176_v26 = vpop.f32.mrb[2].mxu0  ;;  %v214_v45 = vadd.f32 %v213_v23, %v40_v30  ;;  %v175_v2 = vadd.f32 %v174_v24, %v40_v30 }
  0xe0   :  { %v217_v27 = vpop.f32.mrb[2].mxu1  ;;  %v177_v28 = vpop.f32.mrb[3].mxu0  ;;  %v216_v46 = vadd.f32 %v215_v25, %v40_v30  ;;  %v342_v12 = vmax.f32 %v173_v4, 0.0 }
  0xe1   :  { %v218_v29 = vpop.f32.mrb[3].mxu1  ;;  %v344_v52 = vmax.f32 %v214_v45, 0.0  ;;  %v343_v10 = vmax.f32 %v175_v2, 0.0 }
  0xe2   :  { %v345_v53 = vmax.f32 %v216_v46, 0.0 }
  0xe4   :  { %v473_v56 = vpack.i.bf16 %v345_v53, %v344_v52 }
  0xe5   :  { %v254_v31 = vpop.f32.mrb[4].mxu0 }
  0xe6   :  { %v295_v32 = vpop.f32.mrb[4].mxu1  ;;  %v256_v34 = vpop.f32.mrb[5].mxu0  ;;  %v255_v43 = vadd.f32 %v254_v31, %v40_v30 }
  0xe7   :  { %v296_v33 = vadd.f32 %v295_v32, %v40_v30  ;;  %v297_v35 = vpop.f32.mrb[5].mxu1  ;;  %v258_v37 = vpop.f32.mrb[6].mxu0  ;;  %v257_v58 = vadd.f32 %v256_v34, %v40_v30 }
  0xe8   :  { %v298_v36 = vadd.f32 %v297_v35, %v40_v30  ;;  %v299_v38 = vpop.f32.mrb[6].mxu1  ;;  %v259_v40 = vpop.f32.mrb[7].mxu0  ;;  %v346_v50 = vmax.f32 %v255_v43, 0.0 }
  0xe9   :  { %v348_v39 = vmax.f32 %v296_v33, 0.0  ;;  %v300_v41 = vpop.f32.mrb[7].mxu1  ;;  %v347_v62 = vmax.f32 %v257_v58, 0.0 }
  0xea   :  { %v349_v42 = vmax.f32 %v298_v36, 0.0 }
  0xec   :  { %v468_v44 = vpack.i.bf16 %v349_v42, %v348_v39 }
  0xed   :  { %v336_v47 = vpop.f32.mrb[8].mxu0 }
  0xee   :  { %469 = vrot.lane.b32.xlu0 %v468_v44, %s512_s0  ;;  %v337_v48 = vadd.f32 %v336_v47, %v40_v30  ;;  %v460_v49 = vpop.f32.mrb[9].mxu0 }
  0xef   :  { %v339_v51 = vpop.f32.mrb[10].mxu0 }
  0xf0   :  { %v350_v54 = vmax.f32 %v337_v48, 0.0  ;;  %v461_v55 = vpop.f32.mrb[11].mxu0 }
  0xf2   :  { %358 = vrot.lane.b32.xlu0 %v346_v50, %s512_s0  ;;  %376 = vrot.lane.b32.xlu1 %v350_v54, %s512_s0 }
  0xf6   :  { %474 = vrot.lane.b32.xlu1 %v473_v56, %s512_s0 }
 0x160   :  { %v470_v57 = vpop.permute.xlu0 %469 }
 0x161   :  { %v472_v59 = vunpack.i.h.bf16 %v470_v57  ;;  %v471_v60 = vunpack.i.l.bf16 %v470_v57 }
 0x163   :  { %v378_v61 = vsel %vm360_vm2, %v471_v60, %v472_v59 }
 0x164   :  { %v377_v63 = vpop.permute.xlu1 %376  ;;  %v383_v5 = vmax.f32 %v346_v50, %v378_v61  ;;  %v359_v11 = vpop.permute.xlu0 %358 }
 0x165   :  { %v379_v0 = vsel %vm360_vm2, %v472_v59, %v377_v63  ;;  %v385_v1 = vmax.f32 %v348_v39, %v377_v63  ;;  %v368_v17 = vmax.f32 %v344_v52, %v359_v11 }
 0x166   :  { %v384_v3 = vmax.f32 %v347_v62, %v379_v0 }
 0x167   :  { %393 = vrot.lane.b32.xlu0 %v385_v1, %s513_s2 }
 0x168   :  { %v475_v6 = vpop.permute.xlu1 %474  ;;  %v478_v7 = vpack.i.bf16 %v384_v3, %v383_v5 }
 0x169   :  { %v477_v8 = vunpack.i.h.bf16 %v475_v6  ;;  %v476_v9 = vunpack.i.l.bf16 %v475_v6 }
 0x16a   :  { %479 = vrot.lane.b32.xlu1 %v478_v7, %s513_s2 }
 0x16b   :  { %v361_v13 = vsel %vm360_vm2, %v476_v9, %v477_v8  ;;  %v362_v14 = vsel %vm360_vm2, %v477_v8, %v359_v11 }
 0x16c   :  { %v366_v15 = vmax.f32 %v342_v12, %v361_v13  ;;  %v367_v16 = vmax.f32 %v343_v10, %v362_v14 }
 0x1d9   :  { %v394_v18 = vpop.permute.xlu0 %393 }
 0x1da   :  { %v403_v19 = vmax.f32 %v368_v17, %v394_v18 }
 0x1dc   :  { %v450_v20 = vpack.c.bf16 %v403_v19, %v403_v19  ;;  %v480_v21 = vpop.permute.xlu1 %479 }
 0x1dd   :  { %v482_v22 = vunpack.i.h.bf16 %v480_v21  ;;  %v481_v23 = vunpack.i.l.bf16 %v480_v21 }
 0x1de   :  { %419 = vst.msk [vmem:[%s612_s3 + $0x8] sm:$0x7] %vm418_vm3, %v450_v20 }
 0x1df   :  { %v397_v24 = vsel %vm395_vm4, %v482_v22, %v394_v18  ;;  %v396_v25 = vsel %vm395_vm4, %v481_v23, %v482_v22 }
 0x1e0   :  { %v401_v26 = vmax.f32 %v366_v15, %v396_v25  ;;  %v402_v27 = vmax.f32 %v367_v16, %v397_v24 }
 0x1e2   :  { %v449_v28 = vpack.c.bf16 %v402_v27, %v401_v26 }
 0x1e4   :  { %417 = vst [vmem:[%s612_s3] sm:$0x77] %v449_v28 }

// kernel: net_forward.3
= control target key start
LH: loop header
LB: loop body
LE: loop exit
PB: predicated region body
PF: predicated region fallthrough
CT: control target
= control target key end

     0   :  { %v5117_v1 = vmov 0   ;;  %vm322_vm0 = vcmask 130048   ;;  %s5120_s10 = smov 112   ;;  %s5121_s11 = smov 114   ;;  %vm3522_vm1 = vcmask 982016   ;;  %vm3541_vm2 = vcmask 1043456   ;;  %s5974_s0 = inlined_call_operand.vmem [shape: bf16[256,128], index: 0, kind: input, shape index: {}]   ;;  %s5975_s1 = inlined_call_operand.vmem [shape: bf16[16,256], index: 1, kind: input, shape index: {}]   ;;  %s5976_s2 = inlined_call_operand.vmem [shape: f32[16,1], index: 2, kind: input, shape index: {}]   ;;  %s5977_s3 = inlined_call_operand.vmem [shape: bf16[16,120,16], index: 3, kind: input, shape index: {}]   ;;  %s5978_s4 = inlined_call_operand.vmem [shape: f32[120,1], index: 4, kind: input, shape index: {}]   ;;  %s5979_s6 = inlined_call_operand.vmem [shape: f32[84,1], index: 6, kind: input, shape index: {}]   ;;  %s5980_s8 = inlined_call_operand.vmem [shape: f32[10,1], index: 8, kind: input, shape index: {}]   ;;  %s5981_s5 = inlined_call_operand.vmem [shape: bf16[84,120], index: 5, kind: input, shape index: {}]   ;;  %s5982_s7 = inlined_call_operand.vmem [shape: bf16[10,84], index: 7, kind: input, shape index: {}]   ;;  %s5983_s9 = inlined_call_operand.vmem [shape: f32[10,2], index: 9, kind: output, shape index: {}]  }
   0x1   :  { %v4963_v0 = vld [vmem:[%s5974_s0 + $0x40] sm:$0xff]   ;;  %4951 = vset.pattern.permute.xlu0 %v5117_v1  ;;  %4962 = vset.pattern.permute.xlu1 %v5117_v1  ;;  %v4965_v3 = vld [vmem:[%s5974_s0 + $0x48] sm:$0xff]   ;;  %v4967_v5 = vld [vmem:[%s5974_s0 + $0x50] sm:$0xff]   ;;  %s5122_s12 = smov 110   ;;  %s5123_s13 = smov 126   ;;  %vm5136_vm3 = vmmov 0  }
   0x2   :  { %v4964_v2 = vld [vmem:[%s5974_s0] sm:$0xff]   ;;  %4231 = vmatprep.subr.bf16.mxu0 %v4963_v0  ;;  %v4966_v4 = vld [vmem:[%s5974_s0 + $0x8] sm:$0xff]   ;;  %v4968_v6 = vld [vmem:[%s5974_s0 + $0x10] sm:$0xff]   ;;  %s5124_s14 = smov 124   ;;  %s5125_s15 = smov 108   ;;  %vm3665_vm4 = vcmask 1041408  }
   0x3   :  { %4232 = vmatpush3.bf16.msra.mxu0 %v4964_v2  ;;  %v4969_v7 = vld [vmem:[%s5974_s0 + $0x58] sm:$0xff]   ;;  %v4971_v9 = vld [vmem:[%s5974_s0 + $0x60] sm:$0xff]   ;;  %v4973_v11 = vld [vmem:[%s5974_s0 + $0x68] sm:$0xff]   ;;  %s5126_s16 = smov 122   ;;  %s5127_s17 = smov 106   ;;  %vm3661_vm5 = vcmask 687104  }
   0x4   :  { %4233 = vmatprep.subr.bf16.mxu0 %v4965_v3  ;;  %v4970_v8 = vld [vmem:[%s5974_s0 + $0x18] sm:$0xff]   ;;  %v4972_v10 = vld [vmem:[%s5974_s0 + $0x20] sm:$0xff]   ;;  %v4974_v14 = vld [vmem:[%s5974_s0 + $0x28] sm:$0xff]   ;;  %s5128_s18 = smov 120   ;;  %s5129_s19 = smov 104   ;;  %vm3710_vm6 = vcmask 15360  }
   0x5   :  { %v4981_v12 = vld [vmem:[%s5975_s1 + $0x4] ss:$8 sps:$4 sm:$0xff]   ;;  %v4975_v16 = vld [vmem:[%s5974_s0 + $0x70] sm:$0xff]   ;;  %v4977_v18 = vld [vmem:[%s5974_s0 + $0x78] sm:$0xff]   ;;  %s5130_s20 = smov 118   ;;  %s5131_s21 = smov 102  }
   0x6   :  { %v67_v13 = vld [vmem:[%s5976_s2] sm:$0xff]  ;;  %217 = vmatprep.mubr.bf16.mxu0 %v4981_v12  ;;  %v68_v15 = vld [vmem:[%s5976_s2 + $0x8] sm:$0xff]  ;;  %v4976_v17 = vld [vmem:[%s5974_s0 + $0x30] sm:$0xff]   ;;  %s5132_s22 = smov 116   ;;  %s5133_s23 = smov 100   ;;  %vm3712_vm7 = vcmask 9216  }
   0x7   :  { %4234 = vmatpush3.bf16.msra.mxu0 %v4966_v4  ;;  %71 = vperm.xlu0 %4951, %v67_v13   ;;  %v4978_v19 = vld [vmem:[%s5974_s0 + $0x38] sm:$0xff]   ;;  %v4979_v20 = vld [vmem:[%s5975_s1] ss:$8 sps:$4 sm:$0xff]   ;;  %s5118_s0 = smov 96   ;;  %s5119_s1 = smov 64   ;;  %v3430_v56 = vld [vmem:[%s5979_s6 + $0x10] sm:$0xff] }
   0x8   :  { %4235 = vmatprep.subr.bf16.mxu0 %v4967_v5  ;;  %v4982_v40 = vld [vmem:[%s5977_s3 + $0x1a4] sm:$0xff]   ;;  %v4984_v41 = vld [vmem:[%s5977_s3 + $0x3c] sm:$0xff]   ;;  %s5134_s24 = smov 98   ;;  %v3434_v58 = vld [vmem:[%s5979_s6 + $0x30] sm:$0xff] }
   0x9   :  { %4546 = vmatprep.mubr.msk.bf16.mxu1 %vm322_vm0, %v4982_v40  ;;  %v3290_v48 = vld [vmem:[%s5978_s4 + $0x8] sm:$0xff]  ;;  %v3292_v49 = vld [vmem:[%s5978_s4 + $0x18] sm:$0xff]  ;;  %v3428_v55 = vld [vmem:[%s5979_s6] sm:$0xff] }
   0xa   :  { %v3294_v50 = vld [vmem:[%s5978_s4 + $0x28] sm:$0xff]  ;;  %v3296_v51 = vld [vmem:[%s5978_s4 + $0x38] sm:$0xff]  ;;  %v3432_v57 = vld [vmem:[%s5979_s6 + $0x20] sm:$0xff] }
   0xb   :  { %4236 = vmatpush3.bf16.msra.mxu0 %v4968_v6  ;;  %76 = vperm.xlu0 %4951, %v68_v15   ;;  %v3298_v52 = vld [vmem:[%s5978_s4 + $0x48] sm:$0xff]  ;;  %v3300_v53 = vld [vmem:[%s5978_s4 + $0x58] sm:$0xff]  ;;  %v3436_v59 = vld [vmem:[%s5979_s6 + $0x40] sm:$0xff] }
   0xc   :  { %4237 = vmatprep.subr.bf16.mxu0 %v4969_v7  ;;  %v3302_v54 = vld [vmem:[%s5978_s4 + $0x68] sm:$0xff]  ;;  %v3438_v60 = vld [vmem:[%s5979_s6 + $0x50] sm:$0xf]  ;;  %v4986_v3 = vld [vmem:[%s5977_s3 + $0x1b4] sm:$0xff]  }
   0xd   :  { %v3645_v61 = vld [vmem:[%s5980_s8 + $0x8] sm:$0x3]  ;;  %v4983_v0 = vld [vmem:[%s5977_s3 + $0x1ac] sm:$0xff]   ;;  %v4987_v6 = vld [vmem:[%s5977_s3 + $0x1bc] sm:$0xff]  }
   0xe   :  { %v4985_v4 = vld [vmem:[%s5977_s3 + $0x44] sm:$0xff]   ;;  %v4988_v5 = vld [vmem:[%s5977_s3 + $0x4c] sm:$0xff]   ;;  %v4994_v12 = vld [vmem:[%s5977_s3 + $0x1d4] sm:$0xff]  }
   0xf   :  { %4238 = vmatpush3.bf16.msra.mxu0 %v4970_v8  ;;  %v4990_v8 = vld [vmem:[%s5977_s3 + $0x1c4] sm:$0xff]   ;;  %v4995_v15 = vld [vmem:[%s5977_s3 + $0x1dc] ss:$0 sps:$4 sm:$0xff]  }
  0x10   :  { %4239 = vmatprep.subr.bf16.mxu0 %v4971_v9  ;;  %v4989_v9 = vld [vmem:[%s5977_s3 + $0x54] sm:$0xff]   ;;  %v4993_v13 = vld [vmem:[%s5977_s3 + $0x64] sm:$0xff]  }
  0x13   :  { %4240 = vmatpush3.bf16.msra.mxu0 %v4972_v10  ;;  %v4992_v10 = vld [vmem:[%s5977_s3 + $0x5c] sm:$0xff]  }
  0x14   :  { %4241 = vmatprep.subr.bf16.mxu0 %v4973_v11  ;;  %v4991_v11 = vld [vmem:[%s5977_s3 + $0x1cc] sm:$0xff]  }
  0x17   :  { %4242 = vmatpush3.bf16.msra.mxu0 %v4974_v14  ;;  %v4996_v14 = vld [vmem:[%s5977_s3 + $0x6c] sm:$0xff]  }
  0x18   :  { %4243 = vmatprep.subr.bf16.mxu0 %v4975_v16  ;;  %v4998_v16 = vld [vmem:[%s5977_s3 + $0x1e0] sm:$0xff]  }
  0x1b   :  { %4244 = vmatpush3.bf16.msra.mxu0 %v4976_v17  ;;  %v4997_v17 = vld [vmem:[%s5977_s3 + $0x74] ss:$0 sps:$4 sm:$0xff]  }
  0x1c   :  { %4245 = vmatprep.subr.bf16.mxu0 %v4977_v18  ;;  %v5000_v18 = vld [vmem:[%s5977_s3] sm:$0xff]  }
  0x1f   :  { %4246 = vmatpush3.bf16.msra.mxu0 %v4978_v19  ;;  %v4999_v19 = vld [vmem:[%s5977_s3 + $0x1e8] sm:$0xff]  }
  0x22   :  { %218 = vmatmul.mubr.bf16.vlgmr.msra.gmra.mrb[0].mxu0 %v4979_v20  ;;  %v5002_v20 = vld [vmem:[%s5977_s3 + $0x1f0] sm:$0xff]  }
  0x23   :  { %4420 = vmatprep.mubr.msk.bf16.mxu0 %vm322_vm0, %v4984_v41  ;;  %v5020_v41 = vld [vmem:[%s5977_s3 + $0x88] sm:$0xff]  }
  0x86   :  { %v72_v21 = vpop.permute.xlu0 %71 }
  0x8a   :  { %v77_v29 = vpop.permute.xlu0 %76 }
  0xf5   :  { %v4247_v22 = vpop.f32.mrb[0].mxu0 }
  0xf6   :  { %v4248_v23 = vpop.f32.mrb[1].mxu0 }
  0xf7   :  { %v4249_v24 = vadd.f32 %v4248_v23, %v4247_v22  ;;  %v4250_v25 = vpop.f32.mrb[2].mxu0  ;;  %v5004_v23 = vld [vmem:[%s5977_s3 + $0x10] sm:$0xff]  }
  0xf8   :  { %v4251_v26 = vpop.f32.mrb[3].mxu0 }
  0xf9   :  { %v220_v27 = vadd.f32 %v4249_v24, %v72_v21  ;;  %v4252_v28 = vadd.f32 %v4251_v26, %v4250_v25  ;;  %v5001_v21 = vld [vmem:[%s5977_s3 + $0x8] sm:$0xff]   ;;  %v5003_v24 = vld [vmem:[%s5977_s3 + $0x1f8] sm:$0xff]   ;;  %v5006_v26 = vld [vmem:[%s5977_s3 + $0x200] sm:$0xff]  }
  0xfb   :  { %v223_v30 = vadd.f32 %v4252_v28, %v77_v29  ;;  %v226_v31 = vmax.f32 %v220_v27, 0.0  ;;  %v5005_v27 = vld [vmem:[%s5977_s3 + $0x18] sm:$0xff]   ;;  %v5008_v28 = vld [vmem:[%s5977_s3 + $0x20] sm:$0xff]   ;;  %v5007_v29 = vld [vmem:[%s5977_s3 + $0x208] sm:$0xff]  }
  0xfd   :  { %v227_v32 = vmax.f32 %v223_v30, 0.0  ;;  %v5010_v30 = vld [vmem:[%s5977_s3 + $0x210] sm:$0xff]  }
  0xff   :  { %v4952_v33 = vpack.i.bf16 %v227_v32, %v226_v31 }
 0x101   :  { %4953 = vrot.lane.b32.xlu1 %v4952_v33, %s5118_s0  ;;  %v5011_v33 = vld [vmem:[%s5977_s3 + $0x218] ss:$0 sps:$4 sm:$0xff]  }
 0x173   :  { %v4954_v34 = vpop.permute.xlu1 %4953 }
 0x174   :  { %v4956_v35 = vunpack.i.h.bf16 %v4954_v34  ;;  %v4955_v36 = vunpack.i.l.bf16 %v4954_v34  ;;  %v5014_v34 = vld [vmem:[%s5977_s3 + $0x21c] sm:$0xff]  }
 0x176   :  { %v237_v37 = vmax.f32 %v227_v32, %v4956_v35  ;;  %v236_v38 = vmax.f32 %v226_v31, %v4955_v36  ;;  %v5009_v31 = vld [vmem:[%s5977_s3 + $0x28] sm:$0xff]   ;;  %v5012_v32 = vld [vmem:[%s5977_s3 + $0x30] sm:$0xff]   ;;  %v5013_v35 = vld [vmem:[%s5977_s3 + $0x38] ss:$0 sps:$4 sm:$0xff]  }
 0x177   :  { %v5016_v36 = vld [vmem:[%s5977_s3 + $0x78] sm:$0xff]  }
 0x178   :  { %v4957_v39 = vpack.i.bf16 %v237_v37, %v236_v38 }
 0x17a   :  { %4958 = vrot.lane.b32.xlu1 %v4957_v39, %s5119_s1  ;;  %v5017_v39 = vld [vmem:[%s5977_s3 + $0x80] sm:$0xff]  }
 0x1ec   :  { %v4959_v42 = vpop.permute.xlu1 %4958 }
 0x1ed   :  { %v4961_v43 = vunpack.i.h.bf16 %v4959_v42  ;;  %v4960_v44 = vunpack.i.l.bf16 %v4959_v42  ;;  %v5019_v42 = vld [vmem:[%s5977_s3 + $0x234] sm:$0xff]  }
 0x1ef   :  { %v247_v45 = vmax.f32 %v237_v37, %v4961_v43  ;;  %v246_v46 = vmax.f32 %v236_v38, %v4960_v44  ;;  %v5015_v37 = vld [vmem:[%s5977_s3 + $0x224] sm:$0xff]   ;;  %v5018_v38 = vld [vmem:[%s5977_s3 + $0x22c] sm:$0xff]   ;;  %v5022_v44 = vld [vmem:[%s5977_s3 + $0x23c] sm:$0xff]  }
 0x1f1   :  { %v5255_v47 = vpack.c.bf16 %v247_v45, %v246_v46  ;;  %v5021_v45 = vld [vmem:[%s5977_s3 + $0x90] sm:$0xff]   ;;  %v5024_v46 = vld [vmem:[%s5977_s3 + $0x98] sm:$0xff]  }
 0x1f3   :  { %1807 = vrot.lane.b32.xlu1 %v5255_v47, %s5120_s10  ;;  %1615 = vrot.lane.b32.xlu0 %v5255_v47, %s5121_s11 }
 0x1f7   :  { %1999 = vrot.lane.b32.xlu1 %v5255_v47, %s5122_s12  ;;  %319 = vrot.lane.b32.xlu0 %v5255_v47, %s5123_s13 }
 0x1fb   :  { %655 = vrot.lane.b32.xlu1 %v5255_v47, %s5124_s14  ;;  %2191 = vrot.lane.b32.xlu0 %v5255_v47, %s5125_s15 }
 0x1ff   :  { %847 = vrot.lane.b32.xlu1 %v5255_v47, %s5126_s16  ;;  %2383 = vrot.lane.b32.xlu0 %v5255_v47, %s5127_s17 }
 0x203   :  { %1039 = vrot.lane.b32.xlu1 %v5255_v47, %s5128_s18  ;;  %2575 = vrot.lane.b32.xlu0 %v5255_v47, %s5129_s19 }
 0x207   :  { %1231 = vrot.lane.b32.xlu1 %v5255_v47, %s5130_s20  ;;  %2767 = vrot.lane.b32.xlu0 %v5255_v47, %s5131_s21 }
 0x20b   :  { %1423 = vrot.lane.b32.xlu1 %v5255_v47, %s5132_s22  ;;  %2959 = vrot.lane.b32.xlu0 %v5255_v47, %s5133_s23 }
 0x20f   :  { %3151 = vrot.lane.b32.xlu0 %v5255_v47, %s5134_s24 }
 0x213   :  { %3311 = vperm.xlu0 %4951, %v3290_v48   ;;  %v5026_v48 = vld [vmem:[%s5977_s3 + $0x24c] sm:$0xff]  }
 0x217   :  { %3321 = vperm.xlu0 %4951, %v3292_v49   ;;  %v5025_v49 = vld [vmem:[%s5977_s3 + $0xa0] sm:$0xff]  }
 0x21b   :  { %3331 = vperm.xlu0 %4951, %v3294_v50   ;;  %v5028_v50 = vld [vmem:[%s5977_s3 + $0xa8] sm:$0xff]  }
 0x21f   :  { %3341 = vperm.xlu0 %4951, %v3296_v51   ;;  %v5027_v51 = vld [vmem:[%s5977_s3 + $0x254] ss:$0 sps:$4 sm:$0xff]  }
 0x223   :  { %3351 = vperm.xlu0 %4951, %v3298_v52   ;;  %v5030_v52 = vld [vmem:[%s5977_s3 + $0x258] sm:$0xff]  }
 0x227   :  { %3361 = vperm.xlu0 %4951, %v3300_v53   ;;  %v5029_v53 = vld [vmem:[%s5977_s3 + $0xb0] ss:$0 sps:$4 sm:$0xff]  }
 0x22b   :  { %3371 = vperm.xlu0 %4951, %v3302_v54   ;;  %v5032_v54 = vld [vmem:[%s5977_s3 + $0xb4] sm:$0xff]  }
 0x22f   :  { %3441 = vperm.xlu0 %4951, %v3428_v55   ;;  %v5031_v55 = vld [vmem:[%s5977_s3 + $0x260] sm:$0xff]  }
 0x233   :  { %3451 = vperm.xlu0 %4951, %v3430_v56   ;;  %v5034_v56 = vld [vmem:[%s5977_s3 + $0x268] sm:$0xff]  }
 0x237   :  { %3461 = vperm.xlu0 %4951, %v3432_v57   ;;  %v5033_v57 = vld [vmem:[%s5977_s3 + $0xbc] sm:$0xff]  }
 0x23b   :  { %3471 = vperm.xlu0 %4951, %v3434_v58  }
 0x23f   :  { %3481 = vperm.xlu0 %4951, %v3436_v59   ;;  %v5036_v59 = vld [vmem:[%s5977_s3 + $0xc4] sm:$0xff]  }
 0x243   :  { %3491 = vperm.xlu0 %4951, %v3438_v60   ;;  %v5035_v60 = vld [vmem:[%s5977_s3 + $0x270] sm:$0xff]  }
 0x247   :  { %3653 = vperm.xlu0 %4951, %v3645_v61  }
 0x265   :  { %v1808_v62 = vpop.permute.xlu1 %1807  ;;  %v1616_v63 = vpop.permute.xlu0 %1615 }
 0x266   :  { %4544 = vmatprep.subr.bf16.mxu1 %v1616_v63 }
 0x267   :  { %4545 = vmatpush3.bf16.msra.mxu1 %v1616_v63  ;;  %v5037_v63 = vld [vmem:[%s5977_s3 + $0xcc] sm:$0xff]  }
 0x268   :  { %4562 = vmatprep.subr.bf16.mxu1 %v1808_v62 }
 0x269   :  { %v2000_v1 = vpop.permute.xlu1 %1999  ;;  %v320_v2 = vpop.permute.xlu0 %319 }
 0x26a   :  { %4418 = vmatprep.subr.bf16.mxu0 %v320_v2  ;;  %4547 = vmatmul.mubr.msk.bf16.vlgmr.msra.gmra.mrb[0].mxu1 %vm322_vm0, %v4983_v0  ;;  %v5040_v0 = vld [vmem:[%s5977_s3 + $0xd4] sm:$0xff]  }
 0x26b   :  { %4419 = vmatpush3.bf16.msra.mxu0 %v320_v2  ;;  %4563 = vmatpush3.bf16.msra.mxu1 %v1808_v62  ;;  %v5038_v62 = vld [vmem:[%s5977_s3 + $0x278] sm:$0xff]   ;;  %v5042_v2 = vld [vmem:[%s5977_s3 + $0x288] sm:$0xff]  }
 0x26c   :  { %4436 = vmatprep.subr.bf16.mxu0 %v5255_v47  ;;  %4580 = vmatprep.subr.bf16.mxu1 %v2000_v1 }
 0x26d   :  { %4550 = vmatprep.mubr.msk.bf16.mxu1 %vm322_vm0, %v4986_v3  ;;  %v656_v7 = vpop.permute.xlu1 %655  ;;  %v2192_v22 = vpop.permute.xlu0 %2191  ;;  %v5041_v3 = vld [vmem:[%s5977_s3 + $0xdc] sm:$0xff]  }
 0x26e   :  { %4421 = vmatmul.mubr.msk.bf16.vlgmr.msra.gmra.mrb[4].mxu0 %vm322_vm0, %v4985_v4  ;;  %v5044_v4 = vld [vmem:[%s5977_s3 + $0xe4] sm:$0xff]  }
 0x26f   :  { %4437 = vmatpush3.bf16.msra.mxu0 %v5255_v47  ;;  %4424 = vmatprep.mubr.msk.bf16.mxu0 %vm322_vm0, %v4988_v5  ;;  %v5023_v47 = vld [vmem:[%s5977_s3 + $0x244] sm:$0xff]   ;;  %v5043_v5 = vld [vmem:[%s5977_s3 + $0x290] ss:$0 sps:$4 sm:$0xff]  }
 0x270   :  { %4454 = vmatprep.subr.bf16.mxu0 %v656_v7 }
 0x271   :  { %v848_v25 = vpop.permute.xlu1 %847  ;;  %v2384_v40 = vpop.permute.xlu0 %2383 }
 0x272   :  { %4551 = vmatmul.mubr.msk.bf16.gmra.mrb[4].mxu1 %vm322_vm0, %v4987_v6  ;;  %v5046_v6 = vld [vmem:[%s5977_s3 + $0x294] sm:$0xff]  }
 0x273   :  { %4554 = vmatprep.mubr.msk.bf16.mxu1 %vm322_vm0, %v4990_v8  ;;  %v5048_v8 = vld [vmem:[%s5977_s3 + $0xf0] sm:$0xff]  }
 0x275   :  { %v1040_v43 = vpop.permute.xlu1 %1039  ;;  %v2576_v58 = vpop.permute.xlu0 %2575 }
 0x276   :  { %4425 = vmatmul.mubr.msk.bf16.gmra.mrb[8].mxu0 %vm322_vm0, %v4989_v9  ;;  %v5047_v9 = vld [vmem:[%s5977_s3 + $0x29c] sm:$0xff]  }
 0x277   :  { %4428 = vmatprep.mubr.msk.bf16.mxu0 %vm322_vm0, %v4992_v10  ;;  %v5050_v10 = vld [vmem:[%s5977_s3 + $0x2a4] sm:$0xff]  }
 0x279   :  { %v1232_v61 = vpop.permute.xlu1 %1231 }
 0x27a   :  { %4555 = vmatmul.mubr.msk.bf16.gmra.mrb[8].mxu1 %vm322_vm0, %v4991_v11  ;;  %v5049_v11 = vld [vmem:[%s5977_s3 + $0xf8] sm:$0xff]  }
 0x27b   :  { %4558 = vmatprep.mubr.msk.bf16.mxu1 %vm322_vm0, %v4994_v12  ;;  %v2768_v12 = vpop.permute.xlu0 %2767 }
 0x27e   :  { %4429 = vmatmul.mubr.msk.bf16.gmra.mrb[12].mxu0 %vm322_vm0, %v4993_v13  ;;  %v5052_v13 = vld [vmem:[%s5977_s3 + $0x100] sm:$0xff]  }
 0x27f   :  { %4432 = vmatprep.mubr.msk.bf16.mxu0 %vm322_vm0, %v4996_v14  ;;  %v5051_v14 = vld [vmem:[%s5977_s3 + $0x2ac] sm:$0xff]  }
 0x282   :  { %4559 = vmatmul.mubr.msk.bf16.gmra.mrb[12].mxu1 %vm322_vm0, %v4995_v15  ;;  %v1424_v15 = vpop.permute.xlu1 %1423 }
 0x283   :  { %4564 = vmatprep.mubr.msk.bf16.mxu1 %vm322_vm0, %v4998_v16  ;;  %v5054_v16 = vld [vmem:[%s5977_s3 + $0x2b4] sm:$0xff]  }
 0x286   :  { %4433 = vmatmul.mubr.msk.bf16.gmra.mrb[16].mxu0 %vm322_vm0, %v4997_v17  ;;  %v5053_v17 = vld [vmem:[%s5977_s3 + $0x108] sm:$0xff]  }
 0x287   :  { %4438 = vmatprep.mubr.msk.bf16.mxu0 %vm322_vm0, %v5000_v18  ;;  %v5056_v18 = vld [vmem:[%s5977_s3 + $0x110] sm:$0xff]  }
 0x28a   :  { %4565 = vmatmul.mubr.msk.bf16.vlgmr.msra.gmra.mrb[0].mxu1 %vm322_vm0, %v4999_v19  ;;  %v5055_v19 = vld [vmem:[%s5977_s3 + $0x2bc] sm:$0xff]  }
 0x28b   :  { %4581 = vmatpush3.bf16.msra.mxu1 %v2000_v1  ;;  %4568 = vmatprep.mubr.msk.bf16.mxu1 %vm322_vm0, %v5002_v20  ;;  %v5039_v1 = vld [vmem:[%s5977_s3 + $0x280] sm:$0xff]  }
 0x28c   :  { %4598 = vmatprep.subr.bf16.mxu1 %v2192_v22  ;;  %v5058_v20 = vld [vmem:[%s5977_s3 + $0x2c4] sm:$0xff]  }
 0x28e   :  { %4439 = vmatmul.mubr.msk.bf16.vlgmr.msra.gmra.mrb[4].mxu0 %vm322_vm0, %v5001_v21  ;;  %v5057_v21 = vld [vmem:[%s5977_s3 + $0x118] sm:$0xff]  }
 0x28f   :  { %4455 = vmatpush3.bf16.msra.mxu0 %v656_v7  ;;  %4442 = vmatprep.mubr.msk.bf16.mxu0 %vm322_vm0, %v5004_v23  ;;  %v5045_v7 = vld [vmem:[%s5977_s3 + $0xec] ss:$0 sps:$4 sm:$0xff]  }
 0x290   :  { %4472 = vmatprep.subr.bf16.mxu0 %v848_v25  ;;  %v5059_v23 = vld [vmem:[%s5977_s3 + $0x2cc] ss:$0 sps:$4 sm:$0xff]  }
 0x292   :  { %4569 = vmatmul.mubr.msk.bf16.gmra.mrb[4].mxu1 %vm322_vm0, %v5003_v24  ;;  %v5062_v24 = vld [vmem:[%s5977_s3 + $0x2d0] sm:$0xff]  }
 0x293   :  { %4572 = vmatprep.mubr.msk.bf16.mxu1 %vm322_vm0, %v5006_v26  ;;  %v3289_v26 = vld [vmem:[%s5978_s4] sm:$0xff] }
 0x294   :  { %3306 = vperm.xlu1 %4962, %v3289_v26   ;;  %v5103_v26 = vld [vmem:[%s5977_s3 + $0x38c] sm:$0xff]  }
 0x296   :  { %4443 = vmatmul.mubr.msk.bf16.gmra.mrb[8].mxu0 %vm322_vm0, %v5005_v27  ;;  %v5064_v27 = vld [vmem:[%s5977_s3 + $0x12c] sm:$0xff]  }
 0x297   :  { %4446 = vmatprep.mubr.msk.bf16.mxu0 %vm322_vm0, %v5008_v28  ;;  %v3291_v28 = vld [vmem:[%s5978_s4 + $0x10] sm:$0xff] }
 0x298   :  { %3316 = vperm.xlu1 %4962, %v3291_v28   ;;  %v5105_v28 = vld [vmem:[%s5977_s3 + $0x39c] sm:$0xff]  }
 0x29a   :  { %4573 = vmatmul.mubr.msk.bf16.gmra.mrb[8].mxu1 %vm322_vm0, %v5007_v29  ;;  %v5063_v29 = vld [vmem:[%s5977_s3 + $0x2d8] sm:$0xff]  }
 0x29b   :  { %4576 = vmatprep.mubr.msk.bf16.mxu1 %vm322_vm0, %v5010_v30  ;;  %v5066_v30 = vld [vmem:[%s5977_s3 + $0x2e0] sm:$0xff]  }
 0x29e   :  { %4447 = vmatmul.mubr.msk.bf16.gmra.mrb[12].mxu0 %vm322_vm0, %v5009_v31  ;;  %v5065_v31 = vld [vmem:[%s5977_s3 + $0x134] sm:$0xff]  }
 0x29f   :  { %4450 = vmatprep.mubr.msk.bf16.mxu0 %vm322_vm0, %v5012_v32  ;;  %v2960_v32 = vpop.permute.xlu0 %2959 }
 0x2a2   :  { %4577 = vmatmul.mubr.msk.bf16.gmra.mrb[16].mxu1 %vm322_vm0, %v5011_v33  ;;  %v5068_v33 = vld [vmem:[%s5977_s3 + $0x13c] sm:$0xff]  }
 0x2a3   :  { %4582 = vmatprep.mubr.msk.bf16.mxu1 %vm322_vm0, %v5014_v34  ;;  %v5067_v34 = vld [vmem:[%s5977_s3 + $0x2e8] sm:$0xff]  }
 0x2a6   :  { %4451 = vmatmul.mubr.msk.bf16.gmra.mrb[20].mxu0 %vm322_vm0, %v5013_v35  ;;  %v5070_v35 = vld [vmem:[%s5977_s3 + $0x2f0] sm:$0xff]  }
 0x2a7   :  { %4456 = vmatprep.mubr.msk.bf16.mxu0 %vm322_vm0, %v5016_v36  ;;  %v5069_v36 = vld [vmem:[%s5977_s3 + $0x144] sm:$0xff]  }
 0x2aa   :  { %4583 = vmatmul.mubr.msk.bf16.vlgmr.msra.gmra.mrb[0].mxu1 %vm322_vm0, %v5015_v37  ;;  %v5072_v37 = vld [vmem:[%s5977_s3 + $0x14c] sm:$0xff]  }
 0x2ab   :  { %4599 = vmatpush3.bf16.msra.mxu1 %v2192_v22  ;;  %4586 = vmatprep.mubr.msk.bf16.mxu1 %vm322_vm0, %v5018_v38  ;;  %v5060_v22 = vld [vmem:[%s5977_s3 + $0x120] sm:$0xff]   ;;  %v5071_v38 = vld [vmem:[%s5977_s3 + $0x2f8] sm:$0xff]  }
 0x2ac   :  { %4616 = vmatprep.subr.bf16.mxu1 %v2384_v40 }
 0x2ae   :  { %4457 = vmatmul.mubr.msk.bf16.vlgmr.msra.gmra.mrb[4].mxu0 %vm322_vm0, %v5017_v39  ;;  %v3293_v39 = vld [vmem:[%s5978_s4 + $0x20] sm:$0xff] }
 0x2af   :  { %4473 = vmatpush3.bf16.msra.mxu0 %v848_v25  ;;  %4460 = vmatprep.mubr.msk.bf16.mxu0 %vm322_vm0, %v5020_v41  ;;  %v5061_v25 = vld [vmem:[%s5977_s3 + $0x128] ss:$0 sps:$4 sm:$0xff]   ;;  %v5073_v41 = vld [vmem:[%s5977_s3 + $0x154] sm:$0xff]  }
 0x2b0   :  { %4490 = vmatprep.subr.bf16.mxu0 %v1040_v43  ;;  %3326 = vperm.xlu1 %4962, %v3293_v39  }
 0x2b2   :  { %4587 = vmatmul.mubr.msk.bf16.gmra.mrb[4].mxu1 %vm322_vm0, %v5019_v42  ;;  %v5076_v42 = vld [vmem:[%s5977_s3 + $0x15c] sm:$0xff]  }
 0x2b3   :  { %4590 = vmatprep.mubr.msk.bf16.mxu1 %vm322_vm0, %v5022_v44  ;;  %v3297_v44 = vld [vmem:[%s5978_s4 + $0x40] sm:$0xff] }
 0x2b6   :  { %4461 = vmatmul.mubr.msk.bf16.gmra.mrb[8].mxu0 %vm322_vm0, %v5021_v45  ;;  %v5075_v45 = vld [vmem:[%s5977_s3 + $0x308] ss:$0 sps:$4 sm:$0xff]  }
 0x2b7   :  { %4464 = vmatprep.mubr.msk.bf16.mxu0 %vm322_vm0, %v5024_v46  ;;  %v5078_v46 = vld [vmem:[%s5977_s3 + $0x30c] sm:$0xff]  }
 0x2ba   :  { %4591 = vmatmul.mubr.msk.bf16.gmra.mrb[8].mxu1 %vm322_vm0, %v5023_v47  ;;  %v3299_v47 = vld [vmem:[%s5978_s4 + $0x50] sm:$0xff] }
 0x2bb   :  { %4594 = vmatprep.mubr.msk.bf16.mxu1 %vm322_vm0, %v5026_v48  ;;  %v5077_v48 = vld [vmem:[%s5977_s3 + $0x164] ss:$0 sps:$4 sm:$0xff]  }
 0x2be   :  { %4465 = vmatmul.mubr.msk.bf16.gmra.mrb[12].mxu0 %vm322_vm0, %v5025_v49  ;;  %v5080_v49 = vld [vmem:[%s5977_s3 + $0x168] sm:$0xff]  }
 0x2bf   :  { %4468 = vmatprep.mubr.msk.bf16.mxu0 %vm322_vm0, %v5028_v50  ;;  %v3301_v50 = vld [vmem:[%s5978_s4 + $0x60] sm:$0xff] }
 0x2c2   :  { %4595 = vmatmul.mubr.msk.bf16.gmra.mrb[20].mxu1 %vm322_vm0, %v5027_v51  ;;  %v5079_v51 = vld [vmem:[%s5977_s3 + $0x314] sm:$0xff]  }
 0x2c3   :  { %4600 = vmatprep.mubr.msk.bf16.mxu1 %vm322_vm0, %v5030_v52  ;;  %v5082_v52 = vld [vmem:[%s5977_s3 + $0x31c] sm:$0xff]  }
 0x2c6   :  { %4469 = vmatmul.mubr.msk.bf16.gmra.mrb[24].mxu0 %vm322_vm0, %v5029_v53  ;;  %v3303_v53 = vld [vmem:[%s5978_s4 + $0x70] sm:$0xff] }
 0x2c7   :  { %4474 = vmatprep.mubr.msk.bf16.mxu0 %vm322_vm0, %v5032_v54  ;;  %v5081_v54 = vld [vmem:[%s5977_s3 + $0x170] sm:$0xff]  }
 0x2ca   :  { %4601 = vmatmul.mubr.msk.bf16.vlgmr.msra.gmra.mrb[0].mxu1 %vm322_vm0, %v5031_v55  ;;  %v3152_v55 = vpop.permute.xlu0 %3151 }
 0x2cb   :  { %4617 = vmatpush3.bf16.msra.mxu1 %v2384_v40  ;;  %4604 = vmatprep.mubr.msk.bf16.mxu1 %vm322_vm0, %v5034_v56  ;;  %v5074_v40 = vld [vmem:[%s5977_s3 + $0x300] sm:$0xff]   ;;  %v5084_v56 = vld [vmem:[%s5977_s3 + $0x178] sm:$0xff]  }
 0x2cc   :  { %4634 = vmatprep.subr.bf16.mxu1 %v2576_v58 }
 0x2ce   :  { %4475 = vmatmul.mubr.msk.bf16.vlgmr.msra.gmra.mrb[4].mxu0 %vm322_vm0, %v5033_v57  ;;  %v3429_v57 = vld [vmem:[%s5979_s6 + $0x8] sm:$0xff] }
 0x2cf   :  { %4491 = vmatpush3.bf16.msra.mxu0 %v1040_v43  ;;  %4478 = vmatprep.mubr.msk.bf16.mxu0 %vm322_vm0, %v5036_v59  ;;  %v3295_v43 = vld [vmem:[%s5978_s4 + $0x30] sm:$0xff] }
 0x2d0   :  { %4508 = vmatprep.subr.bf16.mxu0 %v1232_v61  ;;  %3336 = vperm.xlu1 %4962, %v3295_v43   ;;  %v5086_v59 = vld [vmem:[%s5977_s3 + $0x32c] sm:$0xff]   ;;  %v5109_v43 = vld [vmem:[%s5977_s3 + $0x3bc] ss:$0 sps:$4 sm:$0xff]  }
 0x2d2   :  { %4605 = vmatmul.mubr.msk.bf16.gmra.mrb[4].mxu1 %vm322_vm0, %v5035_v60  ;;  %v3431_v60 = vld [vmem:[%s5979_s6 + $0x18] sm:$0xff] }
 0x2d3   :  { %4608 = vmatprep.mubr.msk.bf16.mxu1 %vm322_vm0, %v5038_v62  ;;  %v5088_v62 = vld [vmem:[%s5977_s3 + $0x188] sm:$0xff]  }
 0x2d4   :  { %3346 = vperm.xlu1 %4962, %v3297_v44  }
 0x2d6   :  { %4479 = vmatmul.mubr.msk.bf16.gmra.mrb[8].mxu0 %vm322_vm0, %v5037_v63  ;;  %v5087_v63 = vld [vmem:[%s5977_s3 + $0x334] sm:$0xff]  }
 0x2d7   :  { %4482 = vmatprep.mubr.msk.bf16.mxu0 %vm322_vm0, %v5040_v0  ;;  %v3433_v0 = vld [vmem:[%s5979_s6 + $0x28] sm:$0xff] }
 0x2d8   :  { %3356 = vperm.xlu1 %4962, %v3299_v47  }
 0x2da   :  { %4609 = vmatmul.mubr.msk.bf16.gmra.mrb[8].mxu1 %vm322_vm0, %v5039_v1  ;;  %v5090_v1 = vld [vmem:[%s5977_s3 + $0x33c] sm:$0xff]  }
 0x2db   :  { %4612 = vmatprep.mubr.msk.bf16.mxu1 %vm322_vm0, %v5042_v2  ;;  %v5089_v2 = vld [vmem:[%s5977_s3 + $0x190] sm:$0xff]  }
 0x2dc   :  { %3366 = vperm.xlu1 %4962, %v3301_v50  }
 0x2de   :  { %4483 = vmatmul.mubr.msk.bf16.gmra.mrb[12].mxu0 %vm322_vm0, %v5041_v3  ;;  %v5092_v3 = vld [vmem:[%s5977_s3 + $0x198] sm:$0xff]  }
 0x2df   :  { %4486 = vmatprep.mubr.msk.bf16.mxu0 %vm322_vm0, %v5044_v4  ;;  %v3435_v4 = vld [vmem:[%s5979_s6 + $0x38] sm:$0xff] }
 0x2e0   :  { %3376 = vperm.xlu1 %4962, %v3303_v53  }
 0x2e2   :  { %4613 = vmatmul.mubr.msk.bf16.gmra.mrb[24].mxu1 %vm322_vm0, %v5043_v5  ;;  %v3437_v5 = vld [vmem:[%s5979_s6 + $0x48] sm:$0xff] }
 0x2e3   :  { %4618 = vmatprep.mubr.msk.bf16.mxu1 %vm322_vm0, %v5046_v6  ;;  %v5091_v6 = vld [vmem:[%s5977_s3 + $0x344] ss:$0 sps:$4 sm:$0xff]  }
 0x2e4   :  { %3446 = vperm.xlu1 %4962, %v3429_v57  }
 0x2e6   :  { %4487 = vmatmul.mubr.msk.bf16.gmra.mrb[28].mxu0 %vm322_vm0, %v5045_v7  ;;  %v5094_v7 = vld [vmem:[%s5977_s3 + $0x348] sm:$0xff]  }
 0x2e7   :  { %4492 = vmatprep.mubr.msk.bf16.mxu0 %vm322_vm0, %v5048_v8  ;;  %v3644_v8 = vld [vmem:[%s5980_s8] sm:$0xff] }
 0x2e8   :  { %3456 = vperm.xlu1 %4962, %v3431_v60  }
 0x2ea   :  { %4619 = vmatmul.mubr.msk.bf16.vlgmr.msra.gmra.mrb[0].mxu1 %vm322_vm0, %v5047_v9  ;;  %v5093_v9 = vld [vmem:[%s5977_s3 + $0x1a0] ss:$0 sps:$4 sm:$0xff]  }
 0x2eb   :  { %4635 = vmatpush3.bf16.msra.mxu1 %v2576_v58  ;;  %4622 = vmatprep.mubr.msk.bf16.mxu1 %vm322_vm0, %v5050_v10  ;;  %v5083_v58 = vld [vmem:[%s5977_s3 + $0x324] sm:$0xff]   ;;  %v5095_v10 = vld [vmem:[%s5977_s3 + $0x350] sm:$0xff]  }
 0x2ec   :  { %4652 = vmatprep.subr.bf16.mxu1 %v2768_v12  ;;  %3466 = vperm.xlu1 %4962, %v3433_v0  }
 0x2ee   :  { %4493 = vmatmul.mubr.msk.bf16.vlgmr.msra.gmra.mrb[4].mxu0 %vm322_vm0, %v5049_v11  ;;  %v5096_v11 = vld [vmem:[%s5977_s3 + $0x358] sm:$0xff]  }
 0x2ef   :  { %4509 = vmatpush3.bf16.msra.mxu0 %v1232_v61  ;;  %4496 = vmatprep.mubr.msk.bf16.mxu0 %vm322_vm0, %v5052_v13  ;;  %v5085_v61 = vld [vmem:[%s5977_s3 + $0x180] sm:$0xff]   ;;  %v5098_v13 = vld [vmem:[%s5977_s3 + $0x368] sm:$0xff]  }
 0x2f0   :  { %4526 = vmatprep.subr.bf16.mxu0 %v1424_v15  ;;  %3476 = vperm.xlu1 %4962, %v3435_v4  }
 0x2f2   :  { %4623 = vmatmul.mubr.msk.bf16.gmra.mrb[4].mxu1 %vm322_vm0, %v5051_v14 }
 0x2f3   :  { %4626 = vmatprep.mubr.msk.bf16.mxu1 %vm322_vm0, %v5054_v16  ;;  %v5099_v16 = vld [vmem:[%s5977_s3 + $0x370] sm:$0xff]  }
 0x2f4   :  { %3486 = vperm.xlu1 %4962, %v3437_v5  }
 0x2f6   :  { %4497 = vmatmul.mubr.msk.bf16.gmra.mrb[8].mxu0 %vm322_vm0, %v5053_v17 }
 0x2f7   :  { %4500 = vmatprep.mubr.msk.bf16.mxu0 %vm322_vm0, %v5056_v18  ;;  %v5100_v18 = vld [vmem:[%s5977_s3 + $0x378] sm:$0xff]  }
 0x2f8   :  { %3648 = vperm.xlu1 %4962, %v3644_v8  }
 0x2fa   :  { %4627 = vmatmul.mubr.msk.bf16.gmra.mrb[8].mxu1 %vm322_vm0, %v5055_v19 }
 0x2fb   :  { %4630 = vmatprep.mubr.msk.bf16.mxu1 %vm322_vm0, %v5058_v20 }
 0x2fe   :  { %4501 = vmatmul.mubr.msk.bf16.gmra.mrb[12].mxu0 %vm322_vm0, %v5057_v21 }
 0x2ff   :  { %4504 = vmatprep.mubr.msk.bf16.mxu0 %vm322_vm0, %v5060_v22 }
 0x302   :  { %4631 = vmatmul.mubr.msk.bf16.gmra.mrb[28].mxu1 %vm322_vm0, %v5059_v23 }
 0x303   :  { %4636 = vmatprep.mubr.msk.bf16.mxu1 %vm322_vm0, %v5062_v24  ;;  %v5101_v24 = vld [vmem:[%s5977_s3 + $0x380] ss:$0 sps:$4 sm:$0xff]  }
 0x306   :  { %4505 = vmatmul.mubr.msk.bf16.gmra.mrb[32].mxu0 %vm322_vm0, %v5061_v25  ;;  %v5102_v25 = vld [vmem:[%s5977_s3 + $0x384] sm:$0xff]  }
 0x307   :  { %4510 = vmatprep.mubr.msk.bf16.mxu0 %vm322_vm0, %v5064_v27  ;;  %v5104_v27 = vld [vmem:[%s5977_s3 + $0x394] sm:$0xff]  }
 0x30a   :  { %4637 = vmatmul.mubr.msk.bf16.vlgmr.msra.gmra.mrb[0].mxu1 %vm322_vm0, %v5063_v29  ;;  %v5106_v29 = vld [vmem:[%s5977_s3 + $0x3a4] sm:$0xff]  }
 0x30b   :  { %4653 = vmatpush3.bf16.msra.mxu1 %v2768_v12  ;;  %4640 = vmatprep.mubr.msk.bf16.mxu1 %vm322_vm0, %v5066_v30  ;;  %v5097_v12 = vld [vmem:[%s5977_s3 + $0x360] sm:$0xff]  }
 0x30c   :  { %4670 = vmatprep.subr.bf16.mxu1 %v2960_v32 }
 0x30e   :  { %4511 = vmatmul.mubr.msk.bf16.vlgmr.msra.gmra.mrb[4].mxu0 %vm322_vm0, %v5065_v31 }
 0x30f   :  { %4527 = vmatpush3.bf16.msra.mxu0 %v1424_v15  ;;  %4514 = vmatprep.mubr.msk.bf16.mxu0 %vm322_vm0, %v5068_v33 }
 0x312   :  { %4641 = vmatmul.mubr.msk.bf16.gmra.mrb[4].mxu1 %vm322_vm0, %v5067_v34  ;;  %v5108_v34 = vld [vmem:[%s5977_s3 + $0x3b4] sm:$0xff]  }
 0x313   :  { %4644 = vmatprep.mubr.msk.bf16.mxu1 %vm322_vm0, %v5070_v35 }
 0x316   :  { %4515 = vmatmul.mubr.msk.bf16.gmra.mrb[8].mxu0 %vm322_vm0, %v5069_v36 }
 0x317   :  { %4518 = vmatprep.mubr.msk.bf16.mxu0 %vm322_vm0, %v5072_v37 }
 0x31a   :  { %4645 = vmatmul.mubr.msk.bf16.gmra.mrb[8].mxu1 %vm322_vm0, %v5071_v38 }
 0x31b   :  { %4648 = vmatprep.mubr.msk.bf16.mxu1 %vm322_vm0, %v5074_v40 }
 0x31e   :  { %4519 = vmatmul.mubr.msk.bf16.gmra.mrb[12].mxu0 %vm322_vm0, %v5073_v41 }
 0x31f   :  { %4522 = vmatprep.mubr.msk.bf16.mxu0 %vm322_vm0, %v5076_v42 }
 0x322   :  { %4649 = vmatmul.mubr.msk.bf16.gmra.mrb[32].mxu1 %vm322_vm0, %v5075_v45 }
 0x323   :  { %4654 = vmatprep.mubr.msk.bf16.mxu1 %vm322_vm0, %v5078_v46 }
 0x326   :  { %4523 = vmatmul.mubr.msk.bf16.gmra.mrb[36].mxu0 %vm322_vm0, %v5077_v48 }
 0x327   :  { %4528 = vmatprep.mubr.msk.bf16.mxu0 %vm322_vm0, %v5080_v49 }
 0x32a   :  { %4655 = vmatmul.mubr.msk.bf16.vlgmr.msra.gmra.mrb[0].mxu1 %vm322_vm0, %v5079_v51 }
 0x32b   :  { %4671 = vmatpush3.bf16.msra.mxu1 %v2960_v32  ;;  %4658 = vmatprep.mubr.msk.bf16.mxu1 %vm322_vm0, %v5082_v52  ;;  %v5107_v32 = vld [vmem:[%s5977_s3 + $0x3ac] sm:$0xff]  }
 0x32c   :  { %4688 = vmatprep.subr.bf16.mxu1 %v3152_v55 }
 0x32e   :  { %4529 = vmatmul.mubr.msk.bf16.vlgmr.msra.gmra.mrb[4].mxu0 %vm322_vm0, %v5081_v54 }
 0x32f   :  { %4532 = vmatprep.mubr.msk.bf16.mxu0 %vm322_vm0, %v5084_v56 }
 0x332   :  { %4659 = vmatmul.mubr.msk.bf16.gmra.mrb[4].mxu1 %vm322_vm0, %v5083_v58 }
 0x333   :  { %4662 = vmatprep.mubr.msk.bf16.mxu1 %vm322_vm0, %v5086_v59 }
 0x336   :  { %4533 = vmatmul.mubr.msk.bf16.gmra.mrb[8].mxu0 %vm322_vm0, %v5085_v61 }
 0x337   :  { %4536 = vmatprep.mubr.msk.bf16.mxu0 %vm322_vm0, %v5088_v62 }
 0x33a   :  { %4663 = vmatmul.mubr.msk.bf16.gmra.mrb[8].mxu1 %vm322_vm0, %v5087_v63 }
 0x33b   :  { %4666 = vmatprep.mubr.msk.bf16.mxu1 %vm322_vm0, %v5090_v1 }
 0x33e   :  { %4537 = vmatmul.mubr.msk.bf16.gmra.mrb[12].mxu0 %vm322_vm0, %v5089_v2 }
 0x33f   :  { %4540 = vmatprep.mubr.msk.bf16.mxu0 %vm322_vm0, %v5092_v3 }
 0x342   :  { %4667 = vmatmul.mubr.msk.bf16.gmra.mrb[36].mxu1 %vm322_vm0, %v5091_v6 }
 0x343   :  { %4672 = vmatprep.mubr.msk.bf16.mxu1 %vm322_vm0, %v5094_v7 }
 0x346   :  { %4541 = vmatmul.mubr.msk.bf16.gmra.mrb[40].mxu0 %vm322_vm0, %v5093_v9 }
 0x34a   :  { %4673 = vmatmul.mubr.msk.bf16.vlgmr.msra.gmra.mrb[0].mxu1 %vm322_vm0, %v5095_v10 }
 0x34b   :  { %4689 = vmatpush3.bf16.msra.mxu1 %v3152_v55  ;;  %4676 = vmatprep.mubr.msk.bf16.mxu1 %vm322_vm0, %v5096_v11 }
 0x352   :  { %4677 = vmatmul.mubr.msk.bf16.gmra.mrb[4].mxu1 %vm322_vm0, %v5097_v12 }
 0x353   :  { %4680 = vmatprep.mubr.msk.bf16.mxu1 %vm322_vm0, %v5098_v13  ;;  %v5110_v13 = vld [vmem:[%s5981_s5] sm:$0xff]  }
 0x354   :  { %4722 = vmatprep.mubr.msk.bf16.mxu0 %vm3522_vm1, %v5110_v13 }
 0x355   :  { %v5818_v14 = vpop.f32.mrb[12].mxu1 }
 0x356   :  { %v5820_v15 = vpop.f32.mrb[13].mxu1 }
 0x357   :  { %v4561_v17 = vpop.f32.mrb[14].mxu1 }
 0x358   :  { %v5828_v19 = vpop.f32.mrb[15].mxu1 }
 0x359   :  { %v4434_v20 = vpop.f32.mrb[16].mxu0 }
 0x35a   :  { %4681 = vmatmul.mubr.msk.bf16.gmra.mrb[8].mxu1 %vm322_vm0, %v5099_v16  ;;  %v429_v21 = vpop.f32.mrb[17].mxu0 }
 0x35b   :  { %4684 = vmatprep.mubr.msk.bf16.mxu1 %vm322_vm0, %v5100_v18  ;;  %v4435_v22 = vpop.f32.mrb[18].mxu0 }
 0x35c   :  { %v432_v23 = vpop.f32.mrb[19].mxu0 }
 0x362   :  { %4685 = vmatmul.mubr.msk.bf16.gmra.mrb[40].mxu1 %vm322_vm0, %v5101_v24 }
 0x363   :  { %4690 = vmatprep.mubr.msk.bf16.mxu1 %vm322_vm0, %v5102_v25 }
 0x36a   :  { %4691 = vmatmul.mubr.msk.bf16.vlgmr.msra.gmra.mrb[0].mxu1 %vm322_vm0, %v5103_v26 }
 0x36b   :  { %4694 = vmatprep.mubr.msk.bf16.mxu1 %vm322_vm0, %v5104_v27 }
 0x372   :  { %4695 = vmatmul.mubr.msk.bf16.gmra.mrb[4].mxu1 %vm322_vm0, %v5105_v28 }
 0x373   :  { %4698 = vmatprep.mubr.msk.bf16.mxu1 %vm322_vm0, %v5106_v29 }
 0x375   :  { %v5856_v30 = vpop.f32.mrb[16].mxu1 }
 0x376   :  { %v5858_v31 = vpop.f32.mrb[17].mxu1 }
 0x377   :  { %v4579_v33 = vpop.f32.mrb[18].mxu1 }
 0x378   :  { %v5866_v35 = vpop.f32.mrb[19].mxu1 }
 0x379   :  { %v4452_v36 = vpop.f32.mrb[20].mxu0 }
 0x37a   :  { %4699 = vmatmul.mubr.msk.bf16.gmra.mrb[8].mxu1 %vm322_vm0, %v5107_v32  ;;  %v596_v37 = vadd.f32 %v4452_v36, %v4434_v20  ;;  %v587_v38 = vpop.f32.mrb[21].mxu0 }
 0x37b   :  { %v588_v39 = vadd.f32 %v587_v38, %v429_v21  ;;  %4702 = vmatprep.mubr.msk.bf16.mxu1 %vm322_vm0, %v5108_v34  ;;  %v4453_v40 = vpop.f32.mrb[22].mxu0 }
 0x37c   :  { %v590_v41 = vpop.f32.mrb[23].mxu0 }
 0x37d   :  { %v591_v42 = vadd.f32 %v590_v41, %v432_v23 }
 0x382   :  { %4703 = vmatmul.mubr.msk.bf16.gmra.mrb[44].mxu1 %vm322_vm0, %v5109_v43 }
 0x395   :  { %v5874_v44 = vpop.f32.mrb[20].mxu1 }
 0x396   :  { %v5876_v45 = vpop.f32.mrb[21].mxu1 }
 0x397   :  { %v4597_v46 = vpop.f32.mrb[22].mxu1 }
 0x398   :  { %v5878_v47 = vpop.f32.mrb[23].mxu1 }
 0x399   :  { %v4470_v48 = vpop.f32.mrb[24].mxu0 }
 0x39a   :  { %v792_v49 = vadd.f32 %v4470_v48, %v596_v37  ;;  %v764_v50 = vpop.f32.mrb[25].mxu0 }
 0x39b   :  { %v790_v51 = vadd.f32 %v764_v50, %v588_v39  ;;  %v4471_v52 = vpop.f32.mrb[26].mxu0 }
 0x39c   :  { %v767_v53 = vpop.f32.mrb[27].mxu0 }
 0x39d   :  { %v791_v54 = vadd.f32 %v767_v53, %v591_v42 }
 0x3b5   :  { %v5880_v55 = vpop.f32.mrb[24].mxu1 }
 0x3b6   :  { %v5882_v56 = vpop.f32.mrb[25].mxu1 }
 0x3b7   :  { %v4615_v57 = vpop.f32.mrb[26].mxu1 }
 0x3b8   :  { %v5884_v58 = vpop.f32.mrb[27].mxu1 }
 0x3b9   :  { %v4488_v59 = vpop.f32.mrb[28].mxu0 }
 0x3ba   :  { %v984_v60 = vadd.f32 %v4488_v59, %v792_v49  ;;  %v956_v61 = vpop.f32.mrb[29].mxu0 }
 0x3bb   :  { %v982_v62 = vadd.f32 %v956_v61, %v790_v51  ;;  %v4489_v63 = vpop.f32.mrb[30].mxu0 }
 0x3bc   :  { %v959_v0 = vpop.f32.mrb[31].mxu0 }
 0x3bd   :  { %v983_v1 = vadd.f32 %v959_v0, %v791_v54 }
 0x3d5   :  { %v4632_v2 = vpop.f32.mrb[28].mxu1 }
 0x3d6   :  { %v2492_v3 = vpop.f32.mrb[29].mxu1 }
 0x3d7   :  { %v4633_v4 = vpop.f32.mrb[30].mxu1 }
 0x3d8   :  { %v2495_v5 = vpop.f32.mrb[31].mxu1 }
 0x3d9   :  { %v4506_v6 = vpop.f32.mrb[32].mxu0 }
 0x3da   :  { %v1176_v7 = vadd.f32 %v4506_v6, %v984_v60  ;;  %v1148_v8 = vpop.f32.mrb[33].mxu0 }
 0x3db   :  { %v1174_v9 = vadd.f32 %v1148_v8, %v982_v62  ;;  %v4507_v10 = vpop.f32.mrb[34].mxu0 }
 0x3dc   :  { %v1151_v11 = vpop.f32.mrb[35].mxu0 }
 0x3dd   :  { %v1175_v12 = vadd.f32 %v1151_v11, %v983_v1 }
 0x3f5   :  { %v4650_v16 = vpop.f32.mrb[32].mxu1 }
 0x3f6   :  { %v2684_v17 = vpop.f32.mrb[33].mxu1 }
 0x3f7   :  { %v4651_v18 = vpop.f32.mrb[34].mxu1 }
 0x3f8   :  { %v2687_v20 = vpop.f32.mrb[35].mxu1  ;;  %v3312_v18 = vpop.permute.xlu0 %3311 }
 0x3f9   :  { %v4524_v21 = vpop.f32.mrb[36].mxu0 }
 0x3fa   :  { %v1368_v22 = vadd.f32 %v4524_v21, %v1176_v7  ;;  %v1340_v23 = vpop.f32.mrb[37].mxu0 }
 0x3fb   :  { %v1366_v24 = vadd.f32 %v1340_v23, %v1174_v9  ;;  %v4525_v25 = vpop.f32.mrb[38].mxu0 }
 0x3fc   :  { %v1343_v26 = vpop.f32.mrb[39].mxu0 }
 0x3fd   :  { %v1367_v27 = vadd.f32 %v1343_v26, %v1175_v12 }
 0x401   :  { %v4530_v28 = vpop.f32.mrb[4].mxu0 }
 0x402   :  { %v1484_v29 = vpop.f32.mrb[5].mxu0 }
 0x403   :  { %v4531_v32 = vpop.f32.mrb[6].mxu0 }
 0x404   :  { %v5890_v33 = vpop.f32.mrb[7].mxu0 }
 0x409   :  { %v5892_v34 = vpop.f32.mrb[8].mxu0 }
 0x40a   :  { %v5894_v36 = vpop.f32.mrb[9].mxu0 }
 0x40b   :  { %v5896_v37 = vpop.f32.mrb[10].mxu0 }
 0x40c   :  { %v5898_v38 = vpop.f32.mrb[11].mxu0 }
 0x411   :  { %v5900_v39 = vpop.f32.mrb[12].mxu0 }
 0x412   :  { %v5902_v40 = vpop.f32.mrb[13].mxu0 }
 0x413   :  { %v5904_v41 = vpop.f32.mrb[14].mxu0 }
 0x414   :  { %v5906_v42 = vpop.f32.mrb[15].mxu0 }
 0x415   :  { %v4668_v43 = vpop.f32.mrb[36].mxu1 }
 0x416   :  { %v2876_v46 = vpop.f32.mrb[37].mxu1 }
 0x417   :  { %v4669_v48 = vpop.f32.mrb[38].mxu1 }
 0x418   :  { %v2879_v49 = vpop.f32.mrb[39].mxu1 }
 0x419   :  { %v4542_v50 = vpop.f32.mrb[40].mxu0 }
 0x41a   :  { %v1560_v51 = vadd.f32 %v4542_v50, %v1368_v22  ;;  %v1532_v52 = vpop.f32.mrb[41].mxu0 }
 0x41b   :  { %v1558_v53 = vadd.f32 %v1532_v52, %v1366_v24  ;;  %v4543_v54 = vpop.f32.mrb[42].mxu0 }
 0x41c   :  { %v1752_v57 = vadd.f32 %v5818_v14, %v1560_v51  ;;  %v1535_v59 = vpop.f32.mrb[43].mxu0 }
 0x41d   :  { %v1750_v60 = vadd.f32 %v5820_v15, %v1558_v53  ;;  %v1559_v61 = vadd.f32 %v1535_v59, %v1367_v27 }
 0x41e   :  { %v1944_v62 = vadd.f32 %v5856_v30, %v1752_v57 }
 0x41f   :  { %v1942_v63 = vadd.f32 %v5858_v31, %v1750_v60  ;;  %v1751_v0 = vadd.f32 %v5828_v19, %v1559_v61 }
 0x420   :  { %v2136_v1 = vadd.f32 %v5874_v44, %v1944_v62 }
 0x421   :  { %v2134_v4 = vadd.f32 %v5876_v45, %v1942_v63  ;;  %v1943_v6 = vadd.f32 %v5866_v35, %v1751_v0  ;;  %v3307_v45 = vpop.permute.xlu1 %3306 }
 0x422   :  { %v2328_v7 = vadd.f32 %v5880_v55, %v2136_v1 }
 0x423   :  { %v2135_v14 = vadd.f32 %v5878_v47, %v1943_v6  ;;  %v2326_v8 = vadd.f32 %v5882_v56, %v2134_v4 }
 0x424   :  { %v2520_v15 = vadd.f32 %v4632_v2, %v2328_v7 }
 0x425   :  { %v2518_v9 = vadd.f32 %v2492_v3, %v2326_v8  ;;  %v2327_v30 = vadd.f32 %v5884_v58, %v2135_v14  ;;  %v3317_v35 = vpop.permute.xlu1 %3316  ;;  %v3322_v3 = vpop.permute.xlu0 %3321 }
 0x426   :  { %v2712_v10 = vadd.f32 %v4650_v16, %v2520_v15 }
 0x427   :  { %v2710_v31 = vadd.f32 %v2684_v17, %v2518_v9  ;;  %v2519_v11 = vadd.f32 %v2495_v5, %v2327_v30 }
 0x428   :  { %v2904_v19 = vadd.f32 %v4668_v43, %v2712_v10 }
 0x429   :  { %v2902_v12 = vadd.f32 %v2876_v46, %v2710_v31  ;;  %v2711_v44 = vadd.f32 %v2687_v20, %v2519_v11  ;;  %v3327_v16 = vpop.permute.xlu1 %3326  ;;  %v3332_v20 = vpop.permute.xlu0 %3331 }
 0x42b   :  { %v2903_v13 = vadd.f32 %v2879_v49, %v2711_v44 }
 0x42d   :  { %v3337_v26 = vpop.permute.xlu1 %3336  ;;  %v3342_v54 = vpop.permute.xlu0 %3341 }
 0x431   :  { %v3352_v8 = vpop.permute.xlu0 %3351 }
 0x435   :  { %v4686_v21 = vpop.f32.mrb[40].mxu1 }
 0x436   :  { %v5920_v55 = vadd.f32 %v4686_v21, %v2904_v19  ;;  %v3068_v47 = vpop.f32.mrb[41].mxu1 }
 0x437   :  { %v5922_v22 = vadd.f32 %v3068_v47, %v2902_v12  ;;  %v4687_v56 = vpop.f32.mrb[42].mxu1 }
 0x438   :  { %v3071_v2 = vpop.f32.mrb[43].mxu1 }
 0x439   :  { %v5924_v58 = vadd.f32 %v3071_v2, %v2903_v13 }
 0x43d   :  { %v4692_v5 = vpop.f32.mrb[0].mxu1 }
 0x43e   :  { %v4750_v17 = vadd.f32 %v4692_v5, %v4530_v28  ;;  %v3212_v23 = vpop.f32.mrb[1].mxu1  ;;  %v3347_v28 = vpop.permute.xlu1 %3346 }
 0x43f   :  { %v4751_v24 = vadd.f32 %v3212_v23, %v1484_v29  ;;  %v4693_v25 = vpop.f32.mrb[2].mxu1 }
 0x440   :  { %v3381_v27 = vadd.f32 %v4750_v17, %v3317_v35  ;;  %v4752_v43 = vadd.f32 %v4693_v25, %v4531_v32  ;;  %v3215_v46 = vpop.f32.mrb[3].mxu1  ;;  %v3362_v35 = vpop.permute.xlu0 %3361 }
 0x441   :  { %v3379_v48 = vadd.f32 %v4751_v24, %v3307_v45  ;;  %v4753_v49 = vadd.f32 %v3215_v46, %v5890_v33 }
 0x442   :  { %v3382_v50 = vadd.f32 %v4752_v43, %v3322_v3  ;;  %v3396_v52 = vmax.f32 %v3381_v27, 0.0 }
 0x443   :  { %v3380_v51 = vadd.f32 %v4753_v49, %v3312_v18  ;;  %v3394_v57 = vmax.f32 %v3379_v48, 0.0 }
 0x444   :  { %v3397_v53 = vmax.f32 %v3382_v50, 0.0  ;;  %v3372_v49 = vpop.permute.xlu0 %3371 }
 0x445   :  { %v3395_v59 = vmax.f32 %v3380_v51, 0.0  ;;  %v4696_v60 = vpop.f32.mrb[4].mxu1 }
 0x446   :  { %v4754_v61 = vadd.f32 %v4696_v60, %v5892_v34  ;;  %v3228_v29 = vpop.f32.mrb[5].mxu1  ;;  %v3410_v62 = vpack.c.bf16 %v3397_v53, %v3396_v52  ;;  %v3357_v34 = vpop.permute.xlu1 %3356  ;;  %v5114_v60 = vld [vmem:[%s5981_s5 + $0x20] sm:$0xff]  }
 0x447   :  { %v4755_v63 = vadd.f32 %v3228_v29, %v5894_v36  ;;  %v4697_v32 = vpop.f32.mrb[6].mxu1  ;;  %v3409_v0 = vpack.c.bf16 %v3395_v59, %v3394_v57  ;;  %v5112_v57 = vld [vmem:[%s5981_s5 + $0x10] sm:$0xff]   ;;  %v5113_v59 = vld [vmem:[%s5981_s5 + $0x18] sm:$0xff]  }
 0x448   :  { %v3385_v1 = vadd.f32 %v4754_v61, %v3337_v26  ;;  %v4756_v33 = vadd.f32 %v4697_v32, %v5896_v37  ;;  %v3231_v4 = vpop.f32.mrb[7].mxu1  ;;  %v5135_v61 = vmov 0.0   ;;  %v3442_v29 = vpop.permute.xlu0 %3441 }
 0x449   :  { %v3383_v6 = vadd.f32 %v4755_v63, %v3327_v16  ;;  %v4757_v7 = vadd.f32 %v3231_v4, %v5898_v38  ;;  %4706 = vmatprep.subr.bf16.mxu0 %v3409_v0 }
 0x44a   :  { %v3386_v14 = vadd.f32 %v4756_v33, %v3342_v54  ;;  %4707 = vmatpush3.bf16.msra.mxu0 %v3409_v0  ;;  %v3400_v9 = vmax.f32 %v3385_v1, 0.0  ;;  %v3367_v56 = vpop.permute.xlu1 %3366 }
 0x44b   :  { %v3384_v15 = vadd.f32 %v4757_v7, %v3332_v20  ;;  %4708 = vmatprep.subr.bf16.mxu0 %v3410_v62  ;;  %v3398_v10 = vmax.f32 %v3383_v6, 0.0 }
 0x44c   :  { %v3401_v30 = vmax.f32 %v3386_v14, 0.0 }
 0x44d   :  { %v3399_v36 = vmax.f32 %v3384_v15, 0.0  ;;  %v4700_v31 = vpop.f32.mrb[8].mxu1 }
 0x44e   :  { %v4758_v11 = vadd.f32 %v4700_v31, %v5900_v39  ;;  %v3244_v19 = vpop.f32.mrb[9].mxu1  ;;  %4709 = vmatpush3.bf16.msra.mxu0 %v3410_v62  ;;  %v3412_v37 = vpack.c.bf16 %v3401_v30, %v3400_v9  ;;  %v3377_v26 = vpop.permute.xlu1 %3376 }
 0x44f   :  { %v4759_v12 = vadd.f32 %v3244_v19, %v5902_v40  ;;  %v4701_v38 = vpop.f32.mrb[10].mxu1  ;;  %v3411_v44 = vpack.c.bf16 %v3399_v36, %v3398_v10  ;;  %v3452_v62 = vpop.permute.xlu0 %3451 }
 0x450   :  { %v3389_v13 = vadd.f32 %v4758_v11, %v3357_v34  ;;  %v4760_v45 = vadd.f32 %v4701_v38, %v5904_v41  ;;  %v3247_v18 = vpop.f32.mrb[11].mxu1 }
 0x451   :  { %v3387_v21 = vadd.f32 %v4759_v12, %v3347_v28  ;;  %v4761_v47 = vadd.f32 %v3247_v18, %v5906_v42  ;;  %4710 = vmatprep.subr.bf16.mxu0 %v3411_v44  ;;  %v5115_v28 = vld [vmem:[%s5981_s5 + $0x28] ss:$0 sps:$4 sm:$0x33]  }
 0x452   :  { %v3390_v2 = vadd.f32 %v4760_v45, %v3362_v35  ;;  %4711 = vmatpush3.bf16.msra.mxu0 %v3411_v44  ;;  %v3404_v3 = vmax.f32 %v3389_v13, 0.0  ;;  %v3447_v63 = vpop.permute.xlu1 %3446 }
 0x453   :  { %v3388_v39 = vadd.f32 %v4761_v47, %v3352_v8  ;;  %4712 = vmatprep.subr.bf16.mxu0 %v3412_v37  ;;  %v3402_v5 = vmax.f32 %v3387_v21, 0.0  ;;  %v3462_v32 = vpop.permute.xlu0 %3461 }
 0x454   :  { %v3405_v16 = vmax.f32 %v3390_v2, 0.0 }
 0x455   :  { %v3403_v40 = vmax.f32 %v3388_v39, 0.0  ;;  %v4704_v17 = vpop.f32.mrb[44].mxu1 }
 0x456   :  { %v3288_v23 = vadd.f32 %v4704_v17, %v5920_v55  ;;  %v3260_v20 = vpop.f32.mrb[45].mxu1  ;;  %4713 = vmatpush3.bf16.msra.mxu0 %v3412_v37  ;;  %v3414_v41 = vpack.c.bf16 %v3405_v16, %v3404_v3  ;;  %v3457_v0 = vpop.permute.xlu1 %3456 }
 0x457   :  { %v3286_v24 = vadd.f32 %v3260_v20, %v5922_v22  ;;  %v4705_v25 = vpop.f32.mrb[46].mxu1  ;;  %v3413_v42 = vpack.c.bf16 %v3403_v40, %v3402_v5  ;;  %v3472_v14 = vpop.permute.xlu0 %3471 }
 0x458   :  { %v3263_v27 = vpop.f32.mrb[47].mxu1  ;;  %v3393_v43 = vadd.f32 %v3377_v26, %v3288_v23 }
 0x459   :  { %v3391_v46 = vadd.f32 %v3367_v56, %v3286_v24  ;;  %v3287_v48 = vadd.f32 %v3263_v27, %v5924_v58  ;;  %4714 = vmatprep.subr.bf16.mxu0 %v3413_v42  ;;  %v5111_v58 = vld [vmem:[%s5981_s5 + $0x8] sm:$0xff]  }
 0x45a   :  { %4715 = vmatpush3.bf16.msra.mxu0 %v3413_v42  ;;  %v3408_v51 = vmax.f32 %v3393_v43, 0.0  ;;  %v3467_v34 = vpop.permute.xlu1 %3466 }
 0x45b   :  { %v3392_v50 = vadd.f32 %v3372_v49, %v3287_v48  ;;  %4716 = vmatprep.subr.bf16.mxu0 %v3414_v41  ;;  %v3406_v55 = vmax.f32 %v3391_v46, 0.0  ;;  %v3482_v12 = vpop.permute.xlu0 %3481 }
 0x45c   :  { %v3416_v54 = vpack.c.bf16 %v3408_v51, %v3408_v51  ;;  %v5116_v51 = vld [vmem:[%s5982_s7] sm:$0x1f]  }
 0x45d   :  { %v3407_v52 = vmax.f32 %v3392_v50, 0.0 }
 0x45e   :  { %4717 = vmatpush3.bf16.msra.mxu0 %v3414_v41  ;;  %v3543_v22 = vsel %vm3541_vm2, %v3416_v54, 0  ;;  %v3477_v13 = vpop.permute.xlu1 %3476 }
 0x45f   :  { %v3415_v53 = vpack.c.bf16 %v3407_v52, %v3406_v55  ;;  %v3492_v5 = vpop.permute.xlu0 %3491 }
 0x461   :  { %4718 = vmatprep.subr.bf16.mxu0 %v3415_v53 }
 0x462   :  { %4719 = vmatpush3.bf16.msra.mxu0 %v3415_v53  ;;  %v3487_v25 = vpop.permute.xlu1 %3486 }
 0x463   :  { %4930 = vmatprep.subr.msk.bf16.mxu0 %vm3541_vm2, %v3416_v54 }
 0x466   :  { %4721 = vmatpush3.bf16.msra.mxu0 %v3543_v22  ;;  %v3649_v55 = vpop.permute.xlu1 %3648  ;;  %v3654_v22 = vpop.permute.xlu0 %3653 }
 0x467   :  { %4734 = vmatprep.subr.bf16.mxu0 %v5135_v61 }
 0x469   :  { %4723 = vmatmul.mubr.msk.bf16.vlgmr.msra.gmra.mrb[44].mxu0 %vm3522_vm1, %v5111_v58 }
 0x46a   :  { %4726 = vmatprep.mubr.msk.bf16.mxu0 %vm3522_vm1, %v5112_v57 }
 0x471   :  { %4727 = vmatmul.mubr.msk.bf16.gmra.mrb[48].mxu0 %vm3522_vm1, %v5113_v59 }
 0x472   :  { %4730 = vmatprep.mubr.msk.bf16.mxu0 %vm3522_vm1, %v5114_v60 }
 0x479   :  { %4731 = vmatmul.mubr.msk.bf16.gmra.mrb[52].mxu0 %vm3522_vm1, %v5115_v28 }
 0x47a   :  { %4746 = vmatprep.mubr.msk.bf16.mxu0 %vm5136_vm3, %v5135_v61 }
 0x53c   :  { %v4724_v1 = vpop.f32.mrb[44].mxu0 }
 0x53d   :  { %v3588_v33 = vadd.f32 %v4724_v1, %v3452_v62  ;;  %v3579_v4 = vpop.f32.mrb[45].mxu0 }
 0x53e   :  { %v3580_v6 = vadd.f32 %v3579_v4, %v3442_v29  ;;  %v4725_v7 = vpop.f32.mrb[46].mxu0 }
 0x53f   :  { %v3591_v8 = vadd.f32 %v4725_v7, %v3457_v0  ;;  %v3582_v15 = vpop.f32.mrb[47].mxu0  ;;  %v3627_v30 = vmax.f32 %v3588_v33, 0.0 }
 0x540   :  { %v3583_v9 = vadd.f32 %v3582_v15, %v3447_v63  ;;  %v3625_v36 = vmax.f32 %v3580_v6, 0.0 }
 0x541   :  { %v3628_v10 = vmax.f32 %v3591_v8, 0.0 }
 0x542   :  { %v3626_v31 = vmax.f32 %v3583_v9, 0.0 }
 0x543   :  { %v3637_v11 = vpack.c.bf16 %v3628_v10, %v3627_v30 }
 0x544   :  { %v3636_v19 = vpack.c.bf16 %v3626_v31, %v3625_v36  ;;  %v4728_v37 = vpop.f32.mrb[48].mxu0 }
 0x545   :  { %v3604_v38 = vadd.f32 %v4728_v37, %v3472_v14  ;;  %v3595_v44 = vpop.f32.mrb[49].mxu0 }
 0x546   :  { %v3596_v45 = vadd.f32 %v3595_v44, %v3462_v32  ;;  %v4729_v18 = vpop.f32.mrb[50].mxu0  ;;  %4735 = vmatpush3.bf16.msra.mxu0 %v3636_v19 }
 0x547   :  { %v3607_v35 = vadd.f32 %v4729_v18, %v3477_v13  ;;  %v3598_v21 = vpop.f32.mrb[51].mxu0  ;;  %4736 = vmatprep.subr.bf16.mxu0 %v5135_v61  ;;  %v3631_v56 = vmax.f32 %v3604_v38, 0.0 }
 0x548   :  { %v3599_v47 = vadd.f32 %v3598_v21, %v3467_v34  ;;  %v3629_v39 = vmax.f32 %v3596_v45, 0.0 }
 0x549   :  { %v3632_v2 = vmax.f32 %v3607_v35, 0.0 }
 0x54a   :  { %v3630_v3 = vmax.f32 %v3599_v47, 0.0  ;;  %4737 = vmatpush3.bf16.msra.mxu0 %v3637_v11 }
 0x54b   :  { %v3639_v16 = vpack.c.bf16 %v3632_v2, %v3631_v56  ;;  %4738 = vmatprep.subr.bf16.mxu0 %v5135_v61 }
 0x54c   :  { %v3638_v40 = vpack.c.bf16 %v3630_v3, %v3629_v39  ;;  %v4732_v17 = vpop.f32.mrb[52].mxu0 }
 0x54d   :  { %v3620_v23 = vadd.f32 %v4732_v17, %v3492_v5  ;;  %v3611_v20 = vpop.f32.mrb[53].mxu0 }
 0x54e   :  { %v3612_v41 = vadd.f32 %v3611_v20, %v3482_v12  ;;  %v4733_v24 = vpop.f32.mrb[54].mxu0  ;;  %4739 = vmatpush3.bf16.msra.mxu0 %v3638_v40 }
 0x54f   :  { %v3614_v42 = vpop.f32.mrb[55].mxu0  ;;  %4740 = vmatprep.subr.bf16.mxu0 %v5135_v61  ;;  %v3635_v27 = vmax.f32 %v3620_v23, 0.0 }
 0x550   :  { %v3615_v26 = vadd.f32 %v3614_v42, %v3487_v25  ;;  %v3633_v43 = vmax.f32 %v3612_v41, 0.0 }
 0x551   :  { %v3641_v49 = vpack.c.bf16 %v3635_v27, %v3635_v27 }
 0x552   :  { %v3634_v46 = vmax.f32 %v3615_v26, 0.0  ;;  %4741 = vmatpush3.bf16.msra.mxu0 %v3639_v16 }
 0x553   :  { %4742 = vmatprep.subr.bf16.mxu0 %v5135_v61  ;;  %v3667_v50 = vsel %vm3665_vm4, %v3641_v49, 0 }
 0x554   :  { %v3640_v48 = vpack.c.bf16 %v3634_v46, %v3633_v43 }
 0x556   :  { %4743 = vmatpush3.bf16.msra.mxu0 %v3640_v48 }
 0x557   :  { %4744 = vmatprep.subr.bf16.mxu0 %v5135_v61 }
 0x55a   :  { %4745 = vmatpush3.bf16.msra.mxu0 %v3667_v50 }
 0x55d   :  { %4747 = vmatmul.mubr.msk.bf16.vlgmr.msra.gmra.mrb[56].mxu0 %vm3661_vm5, %v5116_v51 }
 0x630   :  { %v3703_v52 = vpop.f32.mrb[56].mxu0 }
 0x631   :  { %v3704_v53 = vadd.f32 %v3703_v52, %v3649_v55  ;;  %v4748_v54 = vpop.f32.mrb[57].mxu0 }
 0x632   :  { %v3706_v58 = vpop.f32.mrb[58].mxu0 }
 0x633   :  { %3711 = vst.msk [vmem:[%s5983_s9] sm:$0xff] %vm3710_vm6, %v3704_v53  ;;  %v3707_v57 = vadd.f32 %v3706_v58, %v3654_v22  ;;  %v4749_v59 = vpop.f32.mrb[59].mxu0 }
 0x635   :  { %3713 = vst.msk [vmem:[%s5983_s9 + $0x8] sm:$0x3] %vm3712_vm7, %v3707_v57 }

</bundles_post_ra>
